<compile_context>
chip_gen: v7x
topology: tpu7x:2x2x1
jax: 0.10.0
libtpu: 0.0.40
codegen_flags: <defaults>
</compile_context>

<pallas_src>
import functools

import jax
import jax.numpy as jnp
from jax import lax
from jax.experimental import pallas as pl
from jax.experimental.pallas import tpu as pltpu


# Scoped VMEM limit requested from the compiler.  56 MiB is below v7x's 64 MiB
# physical VMEM and well below v5e/v6e's 128 MiB, while being far above the
# small default scoped limits (16/32 MiB).
_VMEM_LIMIT_BYTES = 56 * 1024 * 1024
# Budget used when sizing tiles (leave headroom below the limit for compiler
# internal scratch).
_VMEM_TILE_BUDGET = 40 * 1024 * 1024


# ---------------------------------------------------------------------------
# Small helpers
# ---------------------------------------------------------------------------
def _round_up(x, m):
    return ((x + m - 1) // m) * m


def _pick_tile(dim, target, align):
    """Largest divisor of `dim` that is <= target and a multiple of `align`
    (TPU (8,128) layout rule); falls back to the full dim (always legal)."""
    if dim <= target:
        return dim
    t = (target // align) * align
    while t >= align:
        if dim % t == 0:
            return t
        t -= align
    return dim


# ---------------------------------------------------------------------------
# Kernels 1 & 3: parallel tiled (M, K) @ (K, N) + bias
# Used for the hoisted input projection (embed @ W_ih + b, bf16 out) and the
# vocab projection (hseq @ W_dense + b, f32 out).  Both grid axes parallel.
# ---------------------------------------------------------------------------
def _matmul_bias_kernel(x_ref, w_ref, b_ref, o_ref):
    x = x_ref[...]
    w = w_ref[...]
    if x.dtype != w.dtype:              # (not hit in this pipeline: both bf16)
        x = x.astype(w.dtype)
    acc = jnp.dot(x, w, preferred_element_type=jnp.float32) + b_ref[...]
    o_ref[...] = acc.astype(o_ref.dtype)


def matmul_bias(x, w, b, *, tm_target=512, tn_target=512,
                out_dtype=jnp.float32, vmem_budget=_VMEM_TILE_BUDGET):
    """y = x @ w + b, tiled over M and N (full K resident), lane-dense output.

    M and N are padded up to tile multiples (and sliced back) so arbitrary
    vocab sizes / row counts never fall back to a full-dimension tile that
    could blow VMEM.  Tile sizes are shrunk to fit `vmem_budget` (double
    buffering included).  For extremely large K a K grid axis would be needed
    (not required for typical E / H sizes)."""
    M, K = x.shape
    K2, N = w.shape
    assert K == K2 and b.shape == (1, N)

    tm = min(tm_target, _round_up(M, 8))
    tn = min(tn_target, _round_up(N, 128))

    out_bytes = jnp.dtype(out_dtype).itemsize

    def _est(tm_, tn_):
        return 2 * (tm_ * K * x.dtype.itemsize
                    + K * tn_ * w.dtype.itemsize
                    + tn_ * b.dtype.itemsize
                    + tm_ * tn_ * out_bytes)

    while _est(tm, tn) > vmem_budget and (tm > 8 or tn > 128):
        if tm >= tn and tm > 8:
            tm = max(8, ((tm // 2) // 8) * 8)
        elif tn > 128:
            tn = max(128, ((tn // 2) // 128) * 128)
        else:
            break

    Mp, Np = _round_up(M, tm), _round_up(N, tn)
    xp = jnp.pad(x, ((0, Mp - M), (0, 0))) if Mp != M else x
    wp = jnp.pad(w, ((0, 0), (0, Np - N))) if Np != N else w
    bp = jnp.pad(b, ((0, 0), (0, Np - N))) if Np != N else b

    out = pl.pallas_call(
        _matmul_bias_kernel,
        out_shape=jax.ShapeDtypeStruct((Mp, Np), out_dtype),
        grid=(Mp // tm, Np // tn),
        in_specs=[
            pl.BlockSpec((tm, K), lambda i, j: (i, 0)),
            pl.BlockSpec((K, tn), lambda i, j: (0, j)),
            pl.BlockSpec((1, tn), lambda i, j: (0, j)),
        ],
        out_specs=pl.BlockSpec((tm, tn), lambda i, j: (i, j)),
        compiler_params=pltpu.CompilerParams(
            dimension_semantics=("parallel", "parallel"),
            vmem_limit_bytes=_VMEM_LIMIT_BYTES),
    )(xp, wp, bp)

    if Mp != M or Np != N:
        out = out[:M, :N]
    return out


# ---------------------------------------------------------------------------
# Kernel 2: sequential LSTM recurrence over a (batch-tile, time-tile) grid.
# gates_x already contains x_t @ W_ih + (b_ih + b_hh) in bf16; only h @ W_hh
# plus the elementwise cell remains inside the serial time loop.
# ---------------------------------------------------------------------------
def _lstm_recurrence_kernel(gx_ref,      # (tb, Tblk, 4Hp) bf16  precomputed gates_x
                            whh_ref,     # (Hp, 4Hp)       bf16  fused hidden weights
                            h0_ref,      # (tb, Hp)        f32   initial hidden
                            c0_ref,      # (tb, Hp)        f32   initial cell
                            hseq_ref,    # (tb, Tblk, Hp)  bf16  hidden states out
                            h_out_ref,   # (tb, Hp)        f32   final hidden
                            c_out_ref,   # (tb, Hp)        f32   final cell
                            h_scr,       # VMEM (tb, Hp)   f32   carried hidden
                            c_scr):      # VMEM (tb, Hp)   f32   carried cell
    t = pl.program_id(1)                 # time axis (innermost, "arbitrary")
    tblk = gx_ref.shape[1]
    Hp = whh_ref.shape[0]

    @pl.when(t == 0)
    def _():
        h_scr[...] = h0_ref[...]
        c_scr[...] = c0_ref[...]

    w_hh = whh_ref[...]                  # resident weights, loaded once
    h = h_scr[...]
    c = c_scr[...]

    # Unrolled time block.  gx is loaded per step (small live vreg set) instead
    # of materializing the whole (tb, Tblk, 4Hp) block in registers.
    for step in range(tblk):
        gx = gx_ref[:, step, :].astype(jnp.float32)          # (tb, 4Hp)
        gates = gx + jnp.dot(h.astype(w_hh.dtype), w_hh,
                             preferred_element_type=jnp.float32)
        # Lane-aligned gate slices (Hp is a multiple of 128).
        i_g = jax.nn.sigmoid(gates[:, 0 * Hp:1 * Hp])
        f_g = jax.nn.sigmoid(gates[:, 1 * Hp:2 * Hp])
        g_g = jnp.tanh(gates[:, 2 * Hp:3 * Hp])
        o_g = jax.nn.sigmoid(gates[:, 3 * Hp:4 * Hp])
        c = f_g * c + i_g * g_g
        h = o_g * jnp.tanh(c)
        hseq_ref[:, pl.ds(step, 1), :] = h[:, None, :].astype(hseq_ref.dtype)

    h_scr[...] = h
    c_scr[...] = c

    # Final-state outputs: written only on the last time step of this batch tile.
    @pl.when(t == pl.num_programs(1) - 1)
    def _():
        h_out_ref[...] = h
        c_out_ref[...] = c


def _derive_time_block(S, tb, Hp, vmem_budget, tblk_cap=64):
    """Pick the time-block length from a VMEM budget (v7x has only 64 MiB).

    Accounts for: double-buffered W_hh (bf16), double-buffered gx / hseq blocks
    (bf16), and the f32 state blocks + scratch."""
    whh_bytes = 2 * Hp * 4 * Hp * 2                      # W_hh, double-buffered
    fixed = 10 * tb * Hp * 4                             # h0/c0/h_n/c_n + scratch
    per_step = 2 * tb * 4 * Hp * 2 + 2 * tb * Hp * 2     # gx + hseq blocks
    avail = vmem_budget - whh_bytes - fixed
    if avail <= per_step:
        tmax = 8
    else:
        tmax = min(tblk_cap, max(8, avail // per_step))
    tmax = max(8, (int(tmax) // 8) * 8)
    # NOTE: falls back to the full S only when S has no multiple-of-8 divisor
    # <= tmax (e.g. prime S); pad S upstream for such shapes.
    return _pick_tile(S, tmax, 8)


def lstm_recurrence(gates_x, w_hh, h0, c0, *, tb_target=128,
                    vmem_budget=_VMEM_TILE_BUDGET):
    B, S, H4 = gates_x.shape
    Hp = w_hh.shape[0]
    assert H4 == 4 * Hp
    # Batch tile: keeps the MXU fed (target >= 128 rows per core) while giving
    # v7x's two TensorCores independent batch tiles when B is large enough.
    tb = _pick_tile(B, tb_target, 8)
    tblk = _derive_time_block(S, tb, Hp, vmem_budget)

    hseq, h_n, c_n = pl.pallas_call(
        _lstm_recurrence_kernel,
        out_shape=(
            jax.ShapeDtypeStruct((B, S, Hp), jnp.bfloat16),   # bf16 hseq
            jax.ShapeDtypeStruct((B, Hp), jnp.float32),
            jax.ShapeDtypeStruct((B, Hp), jnp.float32),
        ),
        grid=(B // tb, S // tblk),
        in_specs=[
            pl.BlockSpec((tb, tblk, 4 * Hp), lambda bi, ti: (bi, ti, 0)),
            # Constant-index resident weights.  (Single-buffering this spec via
            # pipeline_mode=pl.Buffered(1) would free Hp*4Hp*2 bytes; the VMEM
            # budget above already assumes two copies, so this is optional.)
            pl.BlockSpec((Hp, 4 * Hp), lambda bi, ti: (0, 0)),
            pl.BlockSpec((tb, Hp), lambda bi, ti: (bi, 0)),
            pl.BlockSpec((tb, Hp), lambda bi, ti: (bi, 0)),
        ],
        out_specs=(
            pl.BlockSpec((tb, tblk, Hp), lambda bi, ti: (bi, ti, 0)),
            pl.BlockSpec((tb, Hp), lambda bi, ti: (bi, 0)),
            pl.BlockSpec((tb, Hp), lambda bi, ti: (bi, 0)),
        ),
        scratch_shapes=[
            pltpu.VMEM((tb, Hp), jnp.float32),
            pltpu.VMEM((tb, Hp), jnp.float32),
        ],
        compiler_params=pltpu.CompilerParams(
            dimension_semantics=("parallel", "arbitrary"),
            vmem_limit_bytes=_VMEM_LIMIT_BYTES),
    )(gates_x, w_hh, h0, c0)
    return hseq, h_n, c_n


# ---------------------------------------------------------------------------
# Parameter preparation: PyTorch-layout weights -> fused, H-padded TPU weights
# ---------------------------------------------------------------------------
def _fuse_gate_weight(w, hp):
    """PyTorch (4H, K) gate-stacked weight -> fused (K, 4*Hp), gate blocks
    zero-padded from H to Hp so slices stay lane-aligned."""
    four_h, k_in = w.shape
    h = four_h // 4
    w4 = w.reshape(4, h, k_in)               # (4, H, K)
    w4 = jnp.transpose(w4, (2, 0, 1))        # (K, 4, H)
    w4 = jnp.pad(w4, ((0, 0), (0, 0), (0, hp - h)))
    return w4.reshape(k_in, 4 * hp)


def _fuse_gate_bias(b, hp):
    h = b.shape[0] // 4
    b4 = jnp.pad(b.reshape(4, h), ((0, 0), (0, hp - h)))
    return b4.reshape(1, 4 * hp)


def prepare_tpu_params(raw, dtype=jnp.bfloat16):
    """raw: PyTorch-layout params (as loaded from a saved RNNModule)."""
    h = raw["w_hh"].shape[1]
    hp = _round_up(h, 128)
    w_hh = _fuse_gate_weight(raw["w_hh"], hp)                 # (H, 4Hp)
    w_hh = jnp.pad(w_hh, ((0, hp - h), (0, 0)))               # (Hp, 4Hp)
    w_d = jnp.pad(raw["w_dense"].T, ((0, hp - h), (0, 0)))    # (Hp, V)
    return {
        "embedding": raw["embedding"].astype(dtype),          # (V, E)
        "w_ih": _fuse_gate_weight(raw["w_ih"], hp).astype(dtype),   # (E, 4Hp)
        "w_hh": w_hh.astype(dtype),
        "b": _fuse_gate_bias(raw["b_ih"] + raw["b_hh"], hp).astype(jnp.float32),
        "w_dense": w_d.astype(dtype),
        "b_dense": raw["b_dense"][None, :].astype(jnp.float32),
    }


# ---------------------------------------------------------------------------
# Forward pass mirroring RNNModule.forward(x, prev_state)
# ---------------------------------------------------------------------------
def rnn_forward(x, prev_state, params):
    """x: int32 (B, S) token ids; prev_state: ((1,B,H), (1,B,H)).

    Returns (logits (B, S, V) f32, (h_n (1,B,H), c_n (1,B,H)))."""
    emb = params["embedding"]
    w_ih = params["w_ih"]
    w_hh = params["w_hh"]
    b = params["b"]
    w_d = params["w_dense"]
    b_d = params["b_dense"]

    B, S = x.shape
    Hp = w_hh.shape[0]
    H = prev_state[0].shape[-1]
    V = w_d.shape[1]

    h0 = prev_state[0][0].astype(jnp.float32)
    c0 = prev_state[1][0].astype(jnp.float32)
    if Hp != H:
        h0 = jnp.pad(h0, ((0, 0), (0, Hp - H)))
        c0 = jnp.pad(c0, ((0, 0), (0, Hp - H)))

    # Embedding lookup (data-dependent row gather) stays as XLA glue.
    embed = emb[x]                                             # (B, S, E) bf16

    # 1) Hoisted input projection, bf16 output (halves HBM + VMEM traffic).
    gates_x = matmul_bias(embed.reshape(B * S, -1), w_ih, b,
                          tm_target=512, tn_target=512,
                          out_dtype=jnp.bfloat16)              # (B*S, 4Hp)
    gates_x = gates_x.reshape(B, S, 4 * Hp)

    # 2) Serial LSTM recurrence (batch-parallel grid, bf16 hseq out).
    hseq, h_n, c_n = lstm_recurrence(gates_x, w_hh, h0, c0)    # (B, S, Hp) bf16

    # 3) Parallel, lane-dense vocab projection with a large M tile; consumes
    #    the bf16 hseq directly (no f32 round trip through HBM).
    logits = matmul_bias(hseq.reshape(B * S, Hp), w_d, b_d,
                         tm_target=1024, tn_target=512,
                         out_dtype=jnp.float32)                # (B*S, V)
    logits = logits.reshape(B, S, V)

    return logits, (h_n[:, :H][None], c_n[:, :H][None])


# ---------------------------------------------------------------------------
# Pure-JAX reference on the UNPADDED PyTorch-layout weights, with the same
# bf16 cast points as the kernel path (validates fusion + padding + kernels).
# ---------------------------------------------------------------------------
def rnn_reference(x, prev_state, raw, dtype=jnp.bfloat16):
    H = raw["w_hh"].shape[1]
    emb = raw["embedding"].astype(dtype)
    w_ih = raw["w_ih"].astype(dtype)          # (4H, E)
    w_hh = raw["w_hh"].astype(dtype)          # (4H, H)
    b = (raw["b_ih"] + raw["b_hh"]).astype(jnp.float32)
    w_d = raw["w_dense"].astype(dtype)        # (V, H)
    b_d = raw["b_dense"].astype(jnp.float32)

    B, S = x.shape
    embed = emb[x]
    gx = (jnp.dot(embed.reshape(B * S, -1), w_ih.T,
                  preferred_element_type=jnp.float32) + b)
    gx = gx.astype(dtype).reshape(B, S, 4 * H)     # matches bf16 gates_x

    h = prev_state[0][0].astype(jnp.float32)
    c = prev_state[1][0].astype(jnp.float32)

    def step(carry, gx_t):
        h, c = carry
        gates = gx_t.astype(jnp.float32) + jnp.dot(
            h.astype(dtype), w_hh.T, preferred_element_type=jnp.float32)
        i_g = jax.nn.sigmoid(gates[:, 0 * H:1 * H])
        f_g = jax.nn.sigmoid(gates[:, 1 * H:2 * H])
        g_g = jnp.tanh(gates[:, 2 * H:3 * H])
        o_g = jax.nn.sigmoid(gates[:, 3 * H:4 * H])
        c = f_g * c + i_g * g_g
        h = o_g * jnp.tanh(c)
        return (h, c), h.astype(dtype)             # matches bf16 hseq

    (h, c), hseq_t = lax.scan(step, (h, c), jnp.swapaxes(gx, 0, 1))
    hseq = jnp.swapaxes(hseq_t, 0, 1)
    logits = (jnp.dot(hseq.reshape(B * S, H), w_d.T,
                      preferred_element_type=jnp.float32) + b_d)
    return logits.reshape(B, S, -1), (h[None], c[None])


# ---------------------------------------------------------------------------
# Parameters / state
# ---------------------------------------------------------------------------
def init_raw_params(key, n_vocab, embedding_size, lstm_size):
    """Synthetic PyTorch-layout parameters (nn.Embedding / nn.LSTM / nn.Linear)."""
    ks = jax.random.split(key, 7)
    bound = 1.0 / (lstm_size ** 0.5)
    u = lambda k, shape: jax.random.uniform(k, shape, jnp.float32, -bound, bound)
    return {
        "embedding": jax.random.normal(ks[0], (n_vocab, embedding_size),
                                       jnp.float32),
        "w_ih": u(ks[1], (4 * lstm_size, embedding_size)),
        "w_hh": u(ks[2], (4 * lstm_size, lstm_size)),
        "b_ih": u(ks[3], (4 * lstm_size,)),
        "b_hh": u(ks[4], (4 * lstm_size,)),
        "w_dense": u(ks[5], (n_vocab, lstm_size)),
        "b_dense": u(ks[6], (n_vocab,)),
    }


def zero_state(batch_size, lstm_size):
    return (jnp.zeros((1, batch_size, lstm_size), jnp.float32),
            jnp.zeros((1, batch_size, lstm_size), jnp.float32))


if __name__ == "__main__":
    n_vocab, seq_size, embedding_size, lstm_size = 256, 8, 32, 32
    batch = 2

    key = jax.random.PRNGKey(0)
    k_params, k_tokens = jax.random.split(key)
    raw_params = init_raw_params(k_params, n_vocab, embedding_size, lstm_size)
    params = prepare_tpu_params(raw_params)

    x = jax.random.randint(k_tokens, (batch, seq_size), 0, n_vocab,
                           dtype=jnp.int32)
    prev_state = zero_state(batch, lstm_size)

    fwd = jax.jit(functools.partial(rnn_forward, params=params))
    logits, (h_n, c_n) = fwd(x, prev_state)
    jax.block_until_ready((logits, h_n, c_n))

    assert logits.shape == (batch, seq_size, n_vocab)
    assert h_n.shape == (1, batch, lstm_size)
    assert c_n.shape == (1, batch, lstm_size)

    # Numerical sanity check against a pure-JAX reference on unpadded weights.
    ref = jax.jit(functools.partial(rnn_reference, raw=raw_params))
    ref_logits, (ref_h, ref_c) = ref(x, prev_state)
    jax.block_until_ready((ref_logits, ref_h, ref_c))
    assert jnp.allclose(logits, ref_logits, rtol=2e-2, atol=2e-2)
    assert jnp.allclose(h_n, ref_h, rtol=2e-2, atol=2e-2)
    assert jnp.allclose(c_n, ref_c, rtol=2e-2, atol=2e-2)

    print("KERNEL_OK")
</pallas_src>

<mosaic_0001>
module attributes {stable_mosaic.version = 11 : i64} {
  func.func @_matmul_bias_kernel(%arg0: i32, %arg1: i32, %arg2: memref<16x128xbf16, #tpu.memory_space<vmem>>, %arg3: memref<128x256xbf16, #tpu.memory_space<vmem>>, %arg4: memref<1x256xf32, #tpu.memory_space<vmem>>, %arg5: memref<16x256xf32, #tpu.memory_space<vmem>>) attributes {dimension_semantics = [#tpu.dimension_semantics<parallel>, #tpu.dimension_semantics<parallel>], iteration_bounds = array<i64: 1, 1>, scalar_prefetch = 0 : i64, scratch_operands = 0 : i64, tpu.core_type = #tpu.core_type<tc>, window_params = [{transform_indices = @transform_0, window_bounds = array<i64: 16, 128>}, {transform_indices = @transform_1, window_bounds = array<i64: 128, 256>}, {transform_indices = @transform_2, window_bounds = array<i64: 1, 256>}, {transform_indices = @transform_3, window_bounds = array<i64: 16, 256>}]} {
    %c0 = arith.constant 0 : index
    %c0_0 = arith.constant 0 : index
    %0 = vector.load %arg2[%c0, %c0_0] : memref<16x128xbf16, #tpu.memory_space<vmem>>, vector<16x128xbf16>
    %c0_1 = arith.constant 0 : index
    %c0_2 = arith.constant 0 : index
    %1 = vector.load %arg3[%c0_1, %c0_2] : memref<128x256xbf16, #tpu.memory_space<vmem>>, vector<128x256xbf16>
    %cst = arith.constant dense<0.000000e+00> : vector<16x256xf32>
    %2 = tpu.matmul %0, %1, %cst {dimension_numbers = #tpu.dot_dimension_numbers<[1], [0], [0], [1], [0, 0, 1, 1], [], []>} : vector<16x128xbf16>, vector<128x256xbf16>, vector<16x256xf32> -> vector<16x256xf32>
    %c0_3 = arith.constant 0 : index
    %c0_4 = arith.constant 0 : index
    %3 = vector.load %arg4[%c0_3, %c0_4] : memref<1x256xf32, #tpu.memory_space<vmem>>, vector<1x256xf32>
    %4 = vector.broadcast %3 : vector<1x256xf32> to vector<16x256xf32>
    %5 = arith.addf %2, %4 : vector<16x256xf32>
    %c0_5 = arith.constant 0 : index
    %c0_6 = arith.constant 0 : index
    %6 = vector.load %arg5[%c0_5, %c0_6] : memref<16x256xf32, #tpu.memory_space<vmem>>, vector<16x256xf32>
    tpu.vector_store %arg5[%c0_5, %c0_6], %5 {strides = array<i32>} : memref<16x256xf32, #tpu.memory_space<vmem>>, vector<16x256xf32>,
    return
  }
  func.func @transform_0(%arg0: i32, %arg1: i32) -> (i32, i32) {
    %c0_i32 = arith.constant 0 : i32
    %c0_i32_0 = arith.constant 0 : i32
    return %arg0, %c0_i32 : i32, i32
  }
  func.func @transform_1(%arg0: i32, %arg1: i32) -> (i32, i32) {
    %c0_i32 = arith.constant 0 : i32
    %c0_i32_0 = arith.constant 0 : i32
    return %c0_i32, %arg1 : i32, i32
  }
  func.func @transform_2(%arg0: i32, %arg1: i32) -> (i32, i32) {
    %c0_i32 = arith.constant 0 : i32
    %c0_i32_0 = arith.constant 0 : i32
    return %c0_i32, %arg1 : i32, i32
  }
  func.func @transform_3(%arg0: i32, %arg1: i32) -> (i32, i32) {
    %c0_i32 = arith.constant 0 : i32
    return %arg0, %arg1 : i32, i32
  }
}

module attributes {stable_mosaic.version = 11 : i64} {
  func.func @_matmul_bias_kernel(%arg0: i32, %arg1: i32, %arg2: memref<16x32xbf16, #tpu.memory_space<vmem>>, %arg3: memref<32x512xbf16, #tpu.memory_space<vmem>>, %arg4: memref<1x512xf32, #tpu.memory_space<vmem>>, %arg5: memref<16x512xbf16, #tpu.memory_space<vmem>>) attributes {dimension_semantics = [#tpu.dimension_semantics<parallel>, #tpu.dimension_semantics<parallel>], iteration_bounds = array<i64: 1, 1>, scalar_prefetch = 0 : i64, scratch_operands = 0 : i64, tpu.core_type = #tpu.core_type<tc>, window_params = [{transform_indices = @transform_0, window_bounds = array<i64: 16, 32>}, {transform_indices = @transform_1, window_bounds = array<i64: 32, 512>}, {transform_indices = @transform_2, window_bounds = array<i64: 1, 512>}, {transform_indices = @transform_3, window_bounds = array<i64: 16, 512>}]} {
    %c0 = arith.constant 0 : index
    %c0_0 = arith.constant 0 : index
    %0 = vector.load %arg2[%c0, %c0_0] : memref<16x32xbf16, #tpu.memory_space<vmem>>, vector<16x32xbf16>
    %c0_1 = arith.constant 0 : index
    %c0_2 = arith.constant 0 : index
    %1 = vector.load %arg3[%c0_1, %c0_2] : memref<32x512xbf16, #tpu.memory_space<vmem>>, vector<32x512xbf16>
    %cst = arith.constant dense<0.000000e+00> : vector<16x512xf32>
    %2 = tpu.matmul %0, %1, %cst {dimension_numbers = #tpu.dot_dimension_numbers<[1], [0], [0], [1], [0, 0, 1, 1], [], []>} : vector<16x32xbf16>, vector<32x512xbf16>, vector<16x512xf32> -> vector<16x512xf32>
    %c0_3 = arith.constant 0 : index
    %c0_4 = arith.constant 0 : index
    %3 = vector.load %arg4[%c0_3, %c0_4] : memref<1x512xf32, #tpu.memory_space<vmem>>, vector<1x512xf32>
    %4 = vector.broadcast %3 : vector<1x512xf32> to vector<16x512xf32>
    %5 = arith.addf %2, %4 : vector<16x512xf32>
    %6 = arith.truncf %5 : vector<16x512xf32> to vector<16x512xbf16>
    %c0_5 = arith.constant 0 : index
    %c0_6 = arith.constant 0 : index
    %7 = vector.load %arg5[%c0_5, %c0_6] : memref<16x512xbf16, #tpu.memory_space<vmem>>, vector<16x512xbf16>
    tpu.vector_store %arg5[%c0_5, %c0_6], %6 {strides = array<i32>} : memref<16x512xbf16, #tpu.memory_space<vmem>>, vector<16x512xbf16>,
    return
  }
  func.func @transform_0(%arg0: i32, %arg1: i32) -> (i32, i32) {
    %c0_i32 = arith.constant 0 : i32
    %c0_i32_0 = arith.constant 0 : i32
    return %arg0, %c0_i32 : i32, i32
  }
  func.func @transform_1(%arg0: i32, %arg1: i32) -> (i32, i32) {
    %c0_i32 = arith.constant 0 : i32
    %c0_i32_0 = arith.constant 0 : i32
    return %c0_i32, %arg1 : i32, i32
  }
  func.func @transform_2(%arg0: i32, %arg1: i32) -> (i32, i32) {
    %c0_i32 = arith.constant 0 : i32
    %c0_i32_0 = arith.constant 0 : i32
    return %c0_i32, %arg1 : i32, i32
  }
  func.func @transform_3(%arg0: i32, %arg1: i32) -> (i32, i32) {
    %c0_i32 = arith.constant 0 : i32
    return %arg0, %arg1 : i32, i32
  }
}

module attributes {stable_mosaic.version = 11 : i64} {
  func.func @_lstm_recurrence_kernel(%arg0: i32, %arg1: i32, %arg2: memref<2x8x512xbf16, #tpu.memory_space<vmem>>, %arg3: memref<128x512xbf16, #tpu.memory_space<vmem>>, %arg4: memref<2x128xf32, #tpu.memory_space<vmem>>, %arg5: memref<2x128xf32, #tpu.memory_space<vmem>>, %arg6: memref<2x8x128xbf16, #tpu.memory_space<vmem>>, %arg7: memref<2x128xf32, #tpu.memory_space<vmem>>, %arg8: memref<2x128xf32, #tpu.memory_space<vmem>>, %arg9: memref<2x128xf32, #tpu.memory_space<vmem>>, %arg10: memref<2x128xf32, #tpu.memory_space<vmem>>) attributes {dimension_semantics = [#tpu.dimension_semantics<parallel>, #tpu.dimension_semantics<arbitrary>], iteration_bounds = array<i64: 1, 1>, scalar_prefetch = 0 : i64, scratch_operands = 2 : i64, tpu.core_type = #tpu.core_type<tc>, window_params = [{transform_indices = @transform_0, window_bounds = array<i64: 2, 8, 512>}, {pipeline_mode = #tpu.pipeline_mode<synchronous>, transform_indices = @transform_1, window_bounds = array<i64: 128, 512>}, {transform_indices = @transform_2, window_bounds = array<i64: 2, 128>}, {transform_indices = @transform_3, window_bounds = array<i64: 2, 128>}, {transform_indices = @transform_4, window_bounds = array<i64: 2, 8, 128>}, {transform_indices = @transform_5, window_bounds = array<i64: 2, 128>}, {transform_indices = @transform_6, window_bounds = array<i64: 2, 128>}]} {
    %c0_i32 = arith.constant 0 : i32
    %0 = arith.cmpi eq, %arg1, %c0_i32 : i32
    %1 = arith.extui %0 : i1 to i32
    %c0_i32_0 = arith.constant 0 : i32
    %2 = arith.cmpi ne, %1, %c0_i32_0 : i32
    scf.if %2 {
      %c0_84 = arith.constant 0 : index
      %c0_85 = arith.constant 0 : index
      %283 = vector.load %arg4[%c0_84, %c0_85] : memref<2x128xf32, #tpu.memory_space<vmem>>, vector<2x128xf32>
      %c0_86 = arith.constant 0 : index
      %c0_87 = arith.constant 0 : index
      %284 = vector.load %arg9[%c0_86, %c0_87] : memref<2x128xf32, #tpu.memory_space<vmem>>, vector<2x128xf32>
      tpu.vector_store %arg9[%c0_86, %c0_87], %283 {strides = array<i32>} : memref<2x128xf32, #tpu.memory_space<vmem>>, vector<2x128xf32>,
      %c0_88 = arith.constant 0 : index
      %c0_89 = arith.constant 0 : index
      %285 = vector.load %arg5[%c0_88, %c0_89] : memref<2x128xf32, #tpu.memory_space<vmem>>, vector<2x128xf32>
      %c0_90 = arith.constant 0 : index
      %c0_91 = arith.constant 0 : index
      %286 = vector.load %arg10[%c0_90, %c0_91] : memref<2x128xf32, #tpu.memory_space<vmem>>, vector<2x128xf32>
      tpu.vector_store %arg10[%c0_90, %c0_91], %285 {strides = array<i32>} : memref<2x128xf32, #tpu.memory_space<vmem>>, vector<2x128xf32>,
    } else {
    }
    %c0 = arith.constant 0 : index
    %c0_1 = arith.constant 0 : index
    %3 = vector.load %arg3[%c0, %c0_1] : memref<128x512xbf16, #tpu.memory_space<vmem>>, vector<128x512xbf16>
    %c0_2 = arith.constant 0 : index
    %c0_3 = arith.constant 0 : index
    %4 = vector.load %arg9[%c0_2, %c0_3] : memref<2x128xf32, #tpu.memory_space<vmem>>, vector<2x128xf32>
    %c0_4 = arith.constant 0 : index
    %c0_5 = arith.constant 0 : index
    %5 = vector.load %arg10[%c0_4, %c0_5] : memref<2x128xf32, #tpu.memory_space<vmem>>, vector<2x128xf32>
    %c0_6 = arith.constant 0 : index
    %c0_7 = arith.constant 0 : index
    %c0_8 = arith.constant 0 : index
    %6 = vector.load %arg2[%c0_6, %c0_7, %c0_8] : memref<2x8x512xbf16, #tpu.memory_space<vmem>>, vector<2x1x512xbf16>
    %7 = vector.shape_cast %6 : vector<2x1x512xbf16> to vector<2x512xbf16>
    %8 = arith.extf %7 : vector<2x512xbf16> to vector<2x512xf32>
    %9 = arith.truncf %4 : vector<2x128xf32> to vector<2x128xbf16>
    %cst = arith.constant dense<0.000000e+00> : vector<2x512xf32>
    %10 = tpu.matmul %9, %3, %cst {dimension_numbers = #tpu.dot_dimension_numbers<[1], [0], [0], [1], [0, 0, 1, 1], [], []>} : vector<2x128xbf16>, vector<128x512xbf16>, vector<2x512xf32> -> vector<2x512xf32>
    %11 = arith.addf %8, %10 : vector<2x512xf32>
    %12 = vector.extract_strided_slice %11 {offsets = [0, 0], sizes = [2, 128], strides = [1, 1]} : vector<2x512xf32> to vector<2x128xf32>
    %13 = arith.negf %12 : vector<2x128xf32>
    %14 = math.exp %13 : vector<2x128xf32>
    %cst_9 = arith.constant 1.000000e+00 : f32
    %15 = vector.broadcast %cst_9 : f32 to vector<2x128xf32>
    %16 = arith.addf %15, %14 : vector<2x128xf32>
    %17 = arith.divf %15, %16 : vector<2x128xf32>
    %18 = vector.extract_strided_slice %11 {offsets = [0, 128], sizes = [2, 128], strides = [1, 1]} : vector<2x512xf32> to vector<2x128xf32>
    %19 = arith.negf %18 : vector<2x128xf32>
    %20 = math.exp %19 : vector<2x128xf32>
    %cst_10 = arith.constant 1.000000e+00 : f32
    %21 = vector.broadcast %cst_10 : f32 to vector<2x128xf32>
    %22 = arith.addf %21, %20 : vector<2x128xf32>
    %23 = arith.divf %21, %22 : vector<2x128xf32>
    %24 = vector.extract_strided_slice %11 {offsets = [0, 256], sizes = [2, 128], strides = [1, 1]} : vector<2x512xf32> to vector<2x128xf32>
    %25 = math.tanh %24 : vector<2x128xf32>
    %26 = vector.extract_strided_slice %11 {offsets = [0, 384], sizes = [2, 128], strides = [1, 1]} : vector<2x512xf32> to vector<2x128xf32>
    %27 = arith.negf %26 : vector<2x128xf32>
    %28 = math.exp %27 : vector<2x128xf32>
    %cst_11 = arith.constant 1.000000e+00 : f32
    %29 = vector.broadcast %cst_11 : f32 to vector<2x128xf32>
    %30 = arith.addf %29, %28 : vector<2x128xf32>
    %31 = arith.divf %29, %30 : vector<2x128xf32>
    %32 = arith.mulf %23, %5 : vector<2x128xf32>
    %33 = arith.mulf %17, %25 : vector<2x128xf32>
    %34 = arith.addf %32, %33 : vector<2x128xf32>
    %35 = math.tanh %34 : vector<2x128xf32>
    %36 = arith.mulf %31, %35 : vector<2x128xf32>
    %37 = vector.shape_cast %36 : vector<2x128xf32> to vector<2x1x128xf32>
    %38 = arith.truncf %37 : vector<2x1x128xf32> to vector<2x1x128xbf16>
    %c0_12 = arith.constant 0 : index
    %c0_13 = arith.constant 0 : index
    %c0_14 = arith.constant 0 : index
    %39 = vector.load %arg6[%c0_12, %c0_13, %c0_14] : memref<2x8x128xbf16, #tpu.memory_space<vmem>>, vector<2x1x128xbf16>
    tpu.vector_store %arg6[%c0_12, %c0_13, %c0_14], %38 {strides = array<i32>} : memref<2x8x128xbf16, #tpu.memory_space<vmem>>, vector<2x1x128xbf16>,
    %c0_15 = arith.constant 0 : index
    %c1 = arith.constant 1 : index
    %c0_16 = arith.constant 0 : index
    %40 = vector.load %arg2[%c0_15, %c1, %c0_16] : memref<2x8x512xbf16, #tpu.memory_space<vmem>>, vector<2x1x512xbf16>
    %41 = vector.shape_cast %40 : vector<2x1x512xbf16> to vector<2x512xbf16>
    %42 = arith.extf %41 : vector<2x512xbf16> to vector<2x512xf32>
    %43 = arith.truncf %36 : vector<2x128xf32> to vector<2x128xbf16>
    %cst_17 = arith.constant dense<0.000000e+00> : vector<2x512xf32>
    %44 = tpu.matmul %43, %3, %cst_17 {dimension_numbers = #tpu.dot_dimension_numbers<[1], [0], [0], [1], [0, 0, 1, 1], [], []>} : vector<2x128xbf16>, vector<128x512xbf16>, vector<2x512xf32> -> vector<2x512xf32>
    %45 = arith.addf %42, %44 : vector<2x512xf32>
    %46 = vector.extract_strided_slice %45 {offsets = [0, 0], sizes = [2, 128], strides = [1, 1]} : vector<2x512xf32> to vector<2x128xf32>
    %47 = arith.negf %46 : vector<2x128xf32>
    %48 = math.exp %47 : vector<2x128xf32>
    %cst_18 = arith.constant 1.000000e+00 : f32
    %49 = vector.broadcast %cst_18 : f32 to vector<2x128xf32>
    %50 = arith.addf %49, %48 : vector<2x128xf32>
    %51 = arith.divf %49, %50 : vector<2x128xf32>
    %52 = vector.extract_strided_slice %45 {offsets = [0, 128], sizes = [2, 128], strides = [1, 1]} : vector<2x512xf32> to vector<2x128xf32>
    %53 = arith.negf %52 : vector<2x128xf32>
    %54 = math.exp %53 : vector<2x128xf32>
    %cst_19 = arith.constant 1.000000e+00 : f32
    %55 = vector.broadcast %cst_19 : f32 to vector<2x128xf32>
    %56 = arith.addf %55, %54 : vector<2x128xf32>
    %57 = arith.divf %55, %56 : vector<2x128xf32>
    %58 = vector.extract_strided_slice %45 {offsets = [0, 256], sizes = [2, 128], strides = [1, 1]} : vector<2x512xf32> to vector<2x128xf32>
    %59 = math.tanh %58 : vector<2x128xf32>
    %60 = vector.extract_strided_slice %45 {offsets = [0, 384], sizes = [2, 128], strides = [1, 1]} : vector<2x512xf32> to vector<2x128xf32>
    %61 = arith.negf %60 : vector<2x128xf32>
    %62 = math.exp %61 : vector<2x128xf32>
    %cst_20 = arith.constant 1.000000e+00 : f32
    %63 = vector.broadcast %cst_20 : f32 to vector<2x128xf32>
    %64 = arith.addf %63, %62 : vector<2x128xf32>
    %65 = arith.divf %63, %64 : vector<2x128xf32>
    %66 = arith.mulf %57, %34 : vector<2x128xf32>
    %67 = arith.mulf %51, %59 : vector<2x128xf32>
    %68 = arith.addf %66, %67 : vector<2x128xf32>
    %69 = math.tanh %68 : vector<2x128xf32>
    %70 = arith.mulf %65, %69 : vector<2x128xf32>
    %71 = vector.shape_cast %70 : vector<2x128xf32> to vector<2x1x128xf32>
    %72 = arith.truncf %71 : vector<2x1x128xf32> to vector<2x1x128xbf16>
    %c0_21 = arith.constant 0 : index
    %c1_22 = arith.constant 1 : index
    %c0_23 = arith.constant 0 : index
    %73 = vector.load %arg6[%c0_21, %c1_22, %c0_23] : memref<2x8x128xbf16, #tpu.memory_space<vmem>>, vector<2x1x128xbf16>
    tpu.vector_store %arg6[%c0_21, %c1_22, %c0_23], %72 {strides = array<i32>} : memref<2x8x128xbf16, #tpu.memory_space<vmem>>, vector<2x1x128xbf16>,
    %c0_24 = arith.constant 0 : index
    %c2 = arith.constant 2 : index
    %c0_25 = arith.constant 0 : index
    %74 = vector.load %arg2[%c0_24, %c2, %c0_25] : memref<2x8x512xbf16, #tpu.memory_space<vmem>>, vector<2x1x512xbf16>
    %75 = vector.shape_cast %74 : vector<2x1x512xbf16> to vector<2x512xbf16>
    %76 = arith.extf %75 : vector<2x512xbf16> to vector<2x512xf32>
    %77 = arith.truncf %70 : vector<2x128xf32> to vector<2x128xbf16>
    %cst_26 = arith.constant dense<0.000000e+00> : vector<2x512xf32>
    %78 = tpu.matmul %77, %3, %cst_26 {dimension_numbers = #tpu.dot_dimension_numbers<[1], [0], [0], [1], [0, 0, 1, 1], [], []>} : vector<2x128xbf16>, vector<128x512xbf16>, vector<2x512xf32> -> vector<2x512xf32>
    %79 = arith.addf %76, %78 : vector<2x512xf32>
    %80 = vector.extract_strided_slice %79 {offsets = [0, 0], sizes = [2, 128], strides = [1, 1]} : vector<2x512xf32> to vector<2x128xf32>
    %81 = arith.negf %80 : vector<2x128xf32>
    %82 = math.exp %81 : vector<2x128xf32>
    %cst_27 = arith.constant 1.000000e+00 : f32
    %83 = vector.broadcast %cst_27 : f32 to vector<2x128xf32>
    %84 = arith.addf %83, %82 : vector<2x128xf32>
    %85 = arith.divf %83, %84 : vector<2x128xf32>
    %86 = vector.extract_strided_slice %79 {offsets = [0, 128], sizes = [2, 128], strides = [1, 1]} : vector<2x512xf32> to vector<2x128xf32>
    %87 = arith.negf %86 : vector<2x128xf32>
    %88 = math.exp %87 : vector<2x128xf32>
    %cst_28 = arith.constant 1.000000e+00 : f32
    %89 = vector.broadcast %cst_28 : f32 to vector<2x128xf32>
    %90 = arith.addf %89, %88 : vector<2x128xf32>
    %91 = arith.divf %89, %90 : vector<2x128xf32>
    %92 = vector.extract_strided_slice %79 {offsets = [0, 256], sizes = [2, 128], strides = [1, 1]} : vector<2x512xf32> to vector<2x128xf32>
    %93 = math.tanh %92 : vector<2x128xf32>
    %94 = vector.extract_strided_slice %79 {offsets = [0, 384], sizes = [2, 128], strides = [1, 1]} : vector<2x512xf32> to vector<2x128xf32>
    %95 = arith.negf %94 : vector<2x128xf32>
    %96 = math.exp %95 : vector<2x128xf32>
    %cst_29 = arith.constant 1.000000e+00 : f32
    %97 = vector.broadcast %cst_29 : f32 to vector<2x128xf32>
    %98 = arith.addf %97, %96 : vector<2x128xf32>
    %99 = arith.divf %97, %98 : vector<2x128xf32>
    %100 = arith.mulf %91, %68 : vector<2x128xf32>
    %101 = arith.mulf %85, %93 : vector<2x128xf32>
    %102 = arith.addf %100, %101 : vector<2x128xf32>
    %103 = math.tanh %102 : vector<2x128xf32>
    %104 = arith.mulf %99, %103 : vector<2x128xf32>
    %105 = vector.shape_cast %104 : vector<2x128xf32> to vector<2x1x128xf32>
    %106 = arith.truncf %105 : vector<2x1x128xf32> to vector<2x1x128xbf16>
    %c0_30 = arith.constant 0 : index
    %c2_31 = arith.constant 2 : index
    %c0_32 = arith.constant 0 : index
    %107 = vector.load %arg6[%c0_30, %c2_31, %c0_32] : memref<2x8x128xbf16, #tpu.memory_space<vmem>>, vector<2x1x128xbf16>
    tpu.vector_store %arg6[%c0_30, %c2_31, %c0_32], %106 {strides = array<i32>} : memref<2x8x128xbf16, #tpu.memory_space<vmem>>, vector<2x1x128xbf16>,
    %c0_33 = arith.constant 0 : index
    %c3 = arith.constant 3 : index
    %c0_34 = arith.constant 0 : index
    %108 = vector.load %arg2[%c0_33, %c3, %c0_34] : memref<2x8x512xbf16, #tpu.memory_space<vmem>>, vector<2x1x512xbf16>
    %109 = vector.shape_cast %108 : vector<2x1x512xbf16> to vector<2x512xbf16>
    %110 = arith.extf %109 : vector<2x512xbf16> to vector<2x512xf32>
    %111 = arith.truncf %104 : vector<2x128xf32> to vector<2x128xbf16>
    %cst_35 = arith.constant dense<0.000000e+00> : vector<2x512xf32>
    %112 = tpu.matmul %111, %3, %cst_35 {dimension_numbers = #tpu.dot_dimension_numbers<[1], [0], [0], [1], [0, 0, 1, 1], [], []>} : vector<2x128xbf16>, vector<128x512xbf16>, vector<2x512xf32> -> vector<2x512xf32>
    %113 = arith.addf %110, %112 : vector<2x512xf32>
    %114 = vector.extract_strided_slice %113 {offsets = [0, 0], sizes = [2, 128], strides = [1, 1]} : vector<2x512xf32> to vector<2x128xf32>
    %115 = arith.negf %114 : vector<2x128xf32>
    %116 = math.exp %115 : vector<2x128xf32>
    %cst_36 = arith.constant 1.000000e+00 : f32
    %117 = vector.broadcast %cst_36 : f32 to vector<2x128xf32>
    %118 = arith.addf %117, %116 : vector<2x128xf32>
    %119 = arith.divf %117, %118 : vector<2x128xf32>
    %120 = vector.extract_strided_slice %113 {offsets = [0, 128], sizes = [2, 128], strides = [1, 1]} : vector<2x512xf32> to vector<2x128xf32>
    %121 = arith.negf %120 : vector<2x128xf32>
    %122 = math.exp %121 : vector<2x128xf32>
    %cst_37 = arith.constant 1.000000e+00 : f32
    %123 = vector.broadcast %cst_37 : f32 to vector<2x128xf32>
    %124 = arith.addf %123, %122 : vector<2x128xf32>
    %125 = arith.divf %123, %124 : vector<2x128xf32>
    %126 = vector.extract_strided_slice %113 {offsets = [0, 256], sizes = [2, 128], strides = [1, 1]} : vector<2x512xf32> to vector<2x128xf32>
    %127 = math.tanh %126 : vector<2x128xf32>
    %128 = vector.extract_strided_slice %113 {offsets = [0, 384], sizes = [2, 128], strides = [1, 1]} : vector<2x512xf32> to vector<2x128xf32>
    %129 = arith.negf %128 : vector<2x128xf32>
    %130 = math.exp %129 : vector<2x128xf32>
    %cst_38 = arith.constant 1.000000e+00 : f32
    %131 = vector.broadcast %cst_38 : f32 to vector<2x128xf32>
    %132 = arith.addf %131, %130 : vector<2x128xf32>
    %133 = arith.divf %131, %132 : vector<2x128xf32>
    %134 = arith.mulf %125, %102 : vector<2x128xf32>
    %135 = arith.mulf %119, %127 : vector<2x128xf32>
    %136 = arith.addf %134, %135 : vector<2x128xf32>
    %137 = math.tanh %136 : vector<2x128xf32>
    %138 = arith.mulf %133, %137 : vector<2x128xf32>
    %139 = vector.shape_cast %138 : vector<2x128xf32> to vector<2x1x128xf32>
    %140 = arith.truncf %139 : vector<2x1x128xf32> to vector<2x1x128xbf16>
    %c0_39 = arith.constant 0 : index
    %c3_40 = arith.constant 3 : index
    %c0_41 = arith.constant 0 : index
    %141 = vector.load %arg6[%c0_39, %c3_40, %c0_41] : memref<2x8x128xbf16, #tpu.memory_space<vmem>>, vector<2x1x128xbf16>
    tpu.vector_store %arg6[%c0_39, %c3_40, %c0_41], %140 {strides = array<i32>} : memref<2x8x128xbf16, #tpu.memory_space<vmem>>, vector<2x1x128xbf16>,
    %c0_42 = arith.constant 0 : index
    %c4 = arith.constant 4 : index
    %c0_43 = arith.constant 0 : index
    %142 = vector.load %arg2[%c0_42, %c4, %c0_43] : memref<2x8x512xbf16, #tpu.memory_space<vmem>>, vector<2x1x512xbf16>
    %143 = vector.shape_cast %142 : vector<2x1x512xbf16> to vector<2x512xbf16>
    %144 = arith.extf %143 : vector<2x512xbf16> to vector<2x512xf32>
    %145 = arith.truncf %138 : vector<2x128xf32> to vector<2x128xbf16>
    %cst_44 = arith.constant dense<0.000000e+00> : vector<2x512xf32>
    %146 = tpu.matmul %145, %3, %cst_44 {dimension_numbers = #tpu.dot_dimension_numbers<[1], [0], [0], [1], [0, 0, 1, 1], [], []>} : vector<2x128xbf16>, vector<128x512xbf16>, vector<2x512xf32> -> vector<2x512xf32>
    %147 = arith.addf %144, %146 : vector<2x512xf32>
    %148 = vector.extract_strided_slice %147 {offsets = [0, 0], sizes = [2, 128], strides = [1, 1]} : vector<2x512xf32> to vector<2x128xf32>
    %149 = arith.negf %148 : vector<2x128xf32>
    %150 = math.exp %149 : vector<2x128xf32>
    %cst_45 = arith.constant 1.000000e+00 : f32
    %151 = vector.broadcast %cst_45 : f32 to vector<2x128xf32>
    %152 = arith.addf %151, %150 : vector<2x128xf32>
    %153 = arith.divf %151, %152 : vector<2x128xf32>
    %154 = vector.extract_strided_slice %147 {offsets = [0, 128], sizes = [2, 128], strides = [1, 1]} : vector<2x512xf32> to vector<2x128xf32>
    %155 = arith.negf %154 : vector<2x128xf32>
    %156 = math.exp %155 : vector<2x128xf32>
    %cst_46 = arith.constant 1.000000e+00 : f32
    %157 = vector.broadcast %cst_46 : f32 to vector<2x128xf32>
    %158 = arith.addf %157, %156 : vector<2x128xf32>
    %159 = arith.divf %157, %158 : vector<2x128xf32>
    %160 = vector.extract_strided_slice %147 {offsets = [0, 256], sizes = [2, 128], strides = [1, 1]} : vector<2x512xf32> to vector<2x128xf32>
    %161 = math.tanh %160 : vector<2x128xf32>
    %162 = vector.extract_strided_slice %147 {offsets = [0, 384], sizes = [2, 128], strides = [1, 1]} : vector<2x512xf32> to vector<2x128xf32>
    %163 = arith.negf %162 : vector<2x128xf32>
    %164 = math.exp %163 : vector<2x128xf32>
    %cst_47 = arith.constant 1.000000e+00 : f32
    %165 = vector.broadcast %cst_47 : f32 to vector<2x128xf32>
    %166 = arith.addf %165, %164 : vector<2x128xf32>
    %167 = arith.divf %165, %166 : vector<2x128xf32>
    %168 = arith.mulf %159, %136 : vector<2x128xf32>
    %169 = arith.mulf %153, %161 : vector<2x128xf32>
    %170 = arith.addf %168, %169 : vector<2x128xf32>
    %171 = math.tanh %170 : vector<2x128xf32>
    %172 = arith.mulf %167, %171 : vector<2x128xf32>
    %173 = vector.shape_cast %172 : vector<2x128xf32> to vector<2x1x128xf32>
    %174 = arith.truncf %173 : vector<2x1x128xf32> to vector<2x1x128xbf16>
    %c0_48 = arith.constant 0 : index
    %c4_49 = arith.constant 4 : index
    %c0_50 = arith.constant 0 : index
    %175 = vector.load %arg6[%c0_48, %c4_49, %c0_50] : memref<2x8x128xbf16, #tpu.memory_space<vmem>>, vector<2x1x128xbf16>
    tpu.vector_store %arg6[%c0_48, %c4_49, %c0_50], %174 {strides = array<i32>} : memref<2x8x128xbf16, #tpu.memory_space<vmem>>, vector<2x1x128xbf16>,
    %c0_51 = arith.constant 0 : index
    %c5 = arith.constant 5 : index
    %c0_52 = arith.constant 0 : index
    %176 = vector.load %arg2[%c0_51, %c5, %c0_52] : memref<2x8x512xbf16, #tpu.memory_space<vmem>>, vector<2x1x512xbf16>
    %177 = vector.shape_cast %176 : vector<2x1x512xbf16> to vector<2x512xbf16>
    %178 = arith.extf %177 : vector<2x512xbf16> to vector<2x512xf32>
    %179 = arith.truncf %172 : vector<2x128xf32> to vector<2x128xbf16>
    %cst_53 = arith.constant dense<0.000000e+00> : vector<2x512xf32>
    %180 = tpu.matmul %179, %3, %cst_53 {dimension_numbers = #tpu.dot_dimension_numbers<[1], [0], [0], [1], [0, 0, 1, 1], [], []>} : vector<2x128xbf16>, vector<128x512xbf16>, vector<2x512xf32> -> vector<2x512xf32>
    %181 = arith.addf %178, %180 : vector<2x512xf32>
    %182 = vector.extract_strided_slice %181 {offsets = [0, 0], sizes = [2, 128], strides = [1, 1]} : vector<2x512xf32> to vector<2x128xf32>
    %183 = arith.negf %182 : vector<2x128xf32>
    %184 = math.exp %183 : vector<2x128xf32>
    %cst_54 = arith.constant 1.000000e+00 : f32
    %185 = vector.broadcast %cst_54 : f32 to vector<2x128xf32>
    %186 = arith.addf %185, %184 : vector<2x128xf32>
    %187 = arith.divf %185, %186 : vector<2x128xf32>
    %188 = vector.extract_strided_slice %181 {offsets = [0, 128], sizes = [2, 128], strides = [1, 1]} : vector<2x512xf32> to vector<2x128xf32>
    %189 = arith.negf %188 : vector<2x128xf32>
    %190 = math.exp %189 : vector<2x128xf32>
    %cst_55 = arith.constant 1.000000e+00 : f32
    %191 = vector.broadcast %cst_55 : f32 to vector<2x128xf32>
    %192 = arith.addf %191, %190 : vector<2x128xf32>
    %193 = arith.divf %191, %192 : vector<2x128xf32>
    %194 = vector.extract_strided_slice %181 {offsets = [0, 256], sizes = [2, 128], strides = [1, 1]} : vector<2x512xf32> to vector<2x128xf32>
    %195 = math.tanh %194 : vector<2x128xf32>
    %196 = vector.extract_strided_slice %181 {offsets = [0, 384], sizes = [2, 128], strides = [1, 1]} : vector<2x512xf32> to vector<2x128xf32>
    %197 = arith.negf %196 : vector<2x128xf32>
    %198 = math.exp %197 : vector<2x128xf32>
    %cst_56 = arith.constant 1.000000e+00 : f32
    %199 = vector.broadcast %cst_56 : f32 to vector<2x128xf32>
    %200 = arith.addf %199, %198 : vector<2x128xf32>
    %201 = arith.divf %199, %200 : vector<2x128xf32>
    %202 = arith.mulf %193, %170 : vector<2x128xf32>
    %203 = arith.mulf %187, %195 : vector<2x128xf32>
    %204 = arith.addf %202, %203 : vector<2x128xf32>
    %205 = math.tanh %204 : vector<2x128xf32>
    %206 = arith.mulf %201, %205 : vector<2x128xf32>
    %207 = vector.shape_cast %206 : vector<2x128xf32> to vector<2x1x128xf32>
    %208 = arith.truncf %207 : vector<2x1x128xf32> to vector<2x1x128xbf16>
    %c0_57 = arith.constant 0 : index
    %c5_58 = arith.constant 5 : index
    %c0_59 = arith.constant 0 : index
    %209 = vector.load %arg6[%c0_57, %c5_58, %c0_59] : memref<2x8x128xbf16, #tpu.memory_space<vmem>>, vector<2x1x128xbf16>
    tpu.vector_store %arg6[%c0_57, %c5_58, %c0_59], %208 {strides = array<i32>} : memref<2x8x128xbf16, #tpu.memory_space<vmem>>, vector<2x1x128xbf16>,
    %c0_60 = arith.constant 0 : index
    %c6 = arith.constant 6 : index
    %c0_61 = arith.constant 0 : index
    %210 = vector.load %arg2[%c0_60, %c6, %c0_61] : memref<2x8x512xbf16, #tpu.memory_space<vmem>>, vector<2x1x512xbf16>
    %211 = vector.shape_cast %210 : vector<2x1x512xbf16> to vector<2x512xbf16>
    %212 = arith.extf %211 : vector<2x512xbf16> to vector<2x512xf32>
    %213 = arith.truncf %206 : vector<2x128xf32> to vector<2x128xbf16>
    %cst_62 = arith.constant dense<0.000000e+00> : vector<2x512xf32>
    %214 = tpu.matmul %213, %3, %cst_62 {dimension_numbers = #tpu.dot_dimension_numbers<[1], [0], [0], [1], [0, 0, 1, 1], [], []>} : vector<2x128xbf16>, vector<128x512xbf16>, vector<2x512xf32> -> vector<2x512xf32>
    %215 = arith.addf %212, %214 : vector<2x512xf32>
    %216 = vector.extract_strided_slice %215 {offsets = [0, 0], sizes = [2, 128], strides = [1, 1]} : vector<2x512xf32> to vector<2x128xf32>
    %217 = arith.negf %216 : vector<2x128xf32>
    %218 = math.exp %217 : vector<2x128xf32>
    %cst_63 = arith.constant 1.000000e+00 : f32
    %219 = vector.broadcast %cst_63 : f32 to vector<2x128xf32>
    %220 = arith.addf %219, %218 : vector<2x128xf32>
    %221 = arith.divf %219, %220 : vector<2x128xf32>
    %222 = vector.extract_strided_slice %215 {offsets = [0, 128], sizes = [2, 128], strides = [1, 1]} : vector<2x512xf32> to vector<2x128xf32>
    %223 = arith.negf %222 : vector<2x128xf32>
    %224 = math.exp %223 : vector<2x128xf32>
    %cst_64 = arith.constant 1.000000e+00 : f32
    %225 = vector.broadcast %cst_64 : f32 to vector<2x128xf32>
    %226 = arith.addf %225, %224 : vector<2x128xf32>
    %227 = arith.divf %225, %226 : vector<2x128xf32>
    %228 = vector.extract_strided_slice %215 {offsets = [0, 256], sizes = [2, 128], strides = [1, 1]} : vector<2x512xf32> to vector<2x128xf32>
    %229 = math.tanh %228 : vector<2x128xf32>
    %230 = vector.extract_strided_slice %215 {offsets = [0, 384], sizes = [2, 128], strides = [1, 1]} : vector<2x512xf32> to vector<2x128xf32>
    %231 = arith.negf %230 : vector<2x128xf32>
    %232 = math.exp %231 : vector<2x128xf32>
    %cst_65 = arith.constant 1.000000e+00 : f32
    %233 = vector.broadcast %cst_65 : f32 to vector<2x128xf32>
    %234 = arith.addf %233, %232 : vector<2x128xf32>
    %235 = arith.divf %233, %234 : vector<2x128xf32>
    %236 = arith.mulf %227, %204 : vector<2x128xf32>
    %237 = arith.mulf %221, %229 : vector<2x128xf32>
    %238 = arith.addf %236, %237 : vector<2x128xf32>
    %239 = math.tanh %238 : vector<2x128xf32>
    %240 = arith.mulf %235, %239 : vector<2x128xf32>
    %241 = vector.shape_cast %240 : vector<2x128xf32> to vector<2x1x128xf32>
    %242 = arith.truncf %241 : vector<2x1x128xf32> to vector<2x1x128xbf16>
    %c0_66 = arith.constant 0 : index
    %c6_67 = arith.constant 6 : index
    %c0_68 = arith.constant 0 : index
    %243 = vector.load %arg6[%c0_66, %c6_67, %c0_68] : memref<2x8x128xbf16, #tpu.memory_space<vmem>>, vector<2x1x128xbf16>
    tpu.vector_store %arg6[%c0_66, %c6_67, %c0_68], %242 {strides = array<i32>} : memref<2x8x128xbf16, #tpu.memory_space<vmem>>, vector<2x1x128xbf16>,
    %c0_69 = arith.constant 0 : index
    %c7 = arith.constant 7 : index
    %c0_70 = arith.constant 0 : index
    %244 = vector.load %arg2[%c0_69, %c7, %c0_70] : memref<2x8x512xbf16, #tpu.memory_space<vmem>>, vector<2x1x512xbf16>
    %245 = vector.shape_cast %244 : vector<2x1x512xbf16> to vector<2x512xbf16>
    %246 = arith.extf %245 : vector<2x512xbf16> to vector<2x512xf32>
    %247 = arith.truncf %240 : vector<2x128xf32> to vector<2x128xbf16>
    %cst_71 = arith.constant dense<0.000000e+00> : vector<2x512xf32>
    %248 = tpu.matmul %247, %3, %cst_71 {dimension_numbers = #tpu.dot_dimension_numbers<[1], [0], [0], [1], [0, 0, 1, 1], [], []>} : vector<2x128xbf16>, vector<128x512xbf16>, vector<2x512xf32> -> vector<2x512xf32>
    %249 = arith.addf %246, %248 : vector<2x512xf32>
    %250 = vector.extract_strided_slice %249 {offsets = [0, 0], sizes = [2, 128], strides = [1, 1]} : vector<2x512xf32> to vector<2x128xf32>
    %251 = arith.negf %250 : vector<2x128xf32>
    %252 = math.exp %251 : vector<2x128xf32>
    %cst_72 = arith.constant 1.000000e+00 : f32
    %253 = vector.broadcast %cst_72 : f32 to vector<2x128xf32>
    %254 = arith.addf %253, %252 : vector<2x128xf32>
    %255 = arith.divf %253, %254 : vector<2x128xf32>
    %256 = vector.extract_strided_slice %249 {offsets = [0, 128], sizes = [2, 128], strides = [1, 1]} : vector<2x512xf32> to vector<2x128xf32>
    %257 = arith.negf %256 : vector<2x128xf32>
    %258 = math.exp %257 : vector<2x128xf32>
    %cst_73 = arith.constant 1.000000e+00 : f32
    %259 = vector.broadcast %cst_73 : f32 to vector<2x128xf32>
    %260 = arith.addf %259, %258 : vector<2x128xf32>
    %261 = arith.divf %259, %260 : vector<2x128xf32>
    %262 = vector.extract_strided_slice %249 {offsets = [0, 256], sizes = [2, 128], strides = [1, 1]} : vector<2x512xf32> to vector<2x128xf32>
    %263 = math.tanh %262 : vector<2x128xf32>
    %264 = vector.extract_strided_slice %249 {offsets = [0, 384], sizes = [2, 128], strides = [1, 1]} : vector<2x512xf32> to vector<2x128xf32>
    %265 = arith.negf %264 : vector<2x128xf32>
    %266 = math.exp %265 : vector<2x128xf32>
    %cst_74 = arith.constant 1.000000e+00 : f32
    %267 = vector.broadcast %cst_74 : f32 to vector<2x128xf32>
    %268 = arith.addf %267, %266 : vector<2x128xf32>
    %269 = arith.divf %267, %268 : vector<2x128xf32>
    %270 = arith.mulf %261, %238 : vector<2x128xf32>
    %271 = arith.mulf %255, %263 : vector<2x128xf32>
    %272 = arith.addf %270, %271 : vector<2x128xf32>
    %273 = math.tanh %272 : vector<2x128xf32>
    %274 = arith.mulf %269, %273 : vector<2x128xf32>
    %275 = vector.shape_cast %274 : vector<2x128xf32> to vector<2x1x128xf32>
    %276 = arith.truncf %275 : vector<2x1x128xf32> to vector<2x1x128xbf16>
    %c0_75 = arith.constant 0 : index
    %c7_76 = arith.constant 7 : index
    %c0_77 = arith.constant 0 : index
    %277 = vector.load %arg6[%c0_75, %c7_76, %c0_77] : memref<2x8x128xbf16, #tpu.memory_space<vmem>>, vector<2x1x128xbf16>
    tpu.vector_store %arg6[%c0_75, %c7_76, %c0_77], %276 {strides = array<i32>} : memref<2x8x128xbf16, #tpu.memory_space<vmem>>, vector<2x1x128xbf16>,
    %c0_78 = arith.constant 0 : index
    %c0_79 = arith.constant 0 : index
    %278 = vector.load %arg9[%c0_78, %c0_79] : memref<2x128xf32, #tpu.memory_space<vmem>>, vector<2x128xf32>
    tpu.vector_store %arg9[%c0_78, %c0_79], %274 {strides = array<i32>} : memref<2x128xf32, #tpu.memory_space<vmem>>, vector<2x128xf32>,
    %c0_80 = arith.constant 0 : index
    %c0_81 = arith.constant 0 : index
    %279 = vector.load %arg10[%c0_80, %c0_81] : memref<2x128xf32, #tpu.memory_space<vmem>>, vector<2x128xf32>
    tpu.vector_store %arg10[%c0_80, %c0_81], %272 {strides = array<i32>} : memref<2x128xf32, #tpu.memory_space<vmem>>, vector<2x128xf32>,
    %c0_i32_82 = arith.constant 0 : i32
    %280 = arith.cmpi eq, %arg1, %c0_i32_82 : i32
    %281 = arith.extui %280 : i1 to i32
    %c0_i32_83 = arith.constant 0 : i32
    %282 = arith.cmpi ne, %281, %c0_i32_83 : i32
    scf.if %282 {
      %c0_84 = arith.constant 0 : index
      %c0_85 = arith.constant 0 : index
      %283 = vector.load %arg7[%c0_84, %c0_85] : memref<2x128xf32, #tpu.memory_space<vmem>>, vector<2x128xf32>
      tpu.vector_store %arg7[%c0_84, %c0_85], %274 {strides = array<i32>} : memref<2x128xf32, #tpu.memory_space<vmem>>, vector<2x128xf32>,
      %c0_86 = arith.constant 0 : index
      %c0_87 = arith.constant 0 : index
      %284 = vector.load %arg8[%c0_86, %c0_87] : memref<2x128xf32, #tpu.memory_space<vmem>>, vector<2x128xf32>
      tpu.vector_store %arg8[%c0_86, %c0_87], %272 {strides = array<i32>} : memref<2x128xf32, #tpu.memory_space<vmem>>, vector<2x128xf32>,
    } else {
    }
    return
  }
  func.func @transform_0(%arg0: i32, %arg1: i32) -> (i32, i32, i32) {
    %c0_i32 = arith.constant 0 : i32
    %c0_i32_0 = arith.constant 0 : i32
    return %arg0, %arg1, %c0_i32 : i32, i32, i32
  }
  func.func @transform_1(%arg0: i32, %arg1: i32) -> (i32, i32) {
    %c0_i32 = arith.constant 0 : i32
    %c0_i32_0 = arith.constant 0 : i32
    %c0_i32_1 = arith.constant 0 : i32
    return %c0_i32, %c0_i32_0 : i32, i32
  }
  func.func @transform_2(%arg0: i32, %arg1: i32) -> (i32, i32) {
    %c0_i32 = arith.constant 0 : i32
    %c0_i32_0 = arith.constant 0 : i32
    return %arg0, %c0_i32 : i32, i32
  }
  func.func @transform_3(%arg0: i32, %arg1: i32) -> (i32, i32) {
    %c0_i32 = arith.constant 0 : i32
    %c0_i32_0 = arith.constant 0 : i32
    return %arg0, %c0_i32 : i32, i32
  }
  func.func @transform_4(%arg0: i32, %arg1: i32) -> (i32, i32, i32) {
    %c0_i32 = arith.constant 0 : i32
    %c0_i32_0 = arith.constant 0 : i32
    return %arg0, %arg1, %c0_i32 : i32, i32, i32
  }
  func.func @transform_5(%arg0: i32, %arg1: i32) -> (i32, i32) {
    %c0_i32 = arith.constant 0 : i32
    %c0_i32_0 = arith.constant 0 : i32
    return %arg0, %c0_i32 : i32, i32
  }
  func.func @transform_6(%arg0: i32, %arg1: i32) -> (i32, i32) {
    %c0_i32 = arith.constant 0 : i32
    %c0_i32_0 = arith.constant 0 : i32
    return %arg0, %c0_i32 : i32, i32
  }
}

</mosaic_0001>

<bundles_post_ra>
// kernel: rnn_forward.3
= control target key start
LH: loop header
LB: loop body
LE: loop exit
PB: predicated region body
PF: predicated region fallthrough
CT: control target
= control target key end

     0   :  { %v247_v1 = vmov 0   ;;  %vm92_vm0 = vcmask 261120   ;;  %v27_v10 = vlaneseq  ;;  %s310_s1 = inlined_call_operand.vmem [shape: bf16[32,512], index: 1, kind: input, shape index: {}]   ;;  %s311_s0 = inlined_call_operand.vmem [shape: bf16[16,32], index: 0, kind: input, shape index: {}]   ;;  %s312_s2 = inlined_call_operand.vmem [shape: f32[1,512], index: 2, kind: input, shape index: {}]   ;;  %s313_s3 = inlined_call_operand.vmem [shape: bf16[16,512], index: 3, kind: output, shape index: {}]  }
   0x1   :  { %v234_v0 = vld [vmem:[%s310_s1 + $0x4] ss:$16 sps:$4 sm:$0xff]   ;;  %128 = vmatprep.mubr.bf16.mxu0 %v247_v1  ;;  %171 = vmatprep.mubr.bf16.mxu1 %v247_v1  ;;  %v236_v2 = vld [vmem:[%s310_s1 + $0xc] ss:$16 sps:$4 sm:$0xff]   ;;  %v238_v3 = vld [vmem:[%s310_s1] ss:$16 sps:$4 sm:$0xff]  }
   0x2   :  { %96 = vmatprep.subr.bf16.mxu0 %v234_v0  ;;  %v239_v4 = vld [vmem:[%s310_s1 + $0x8] ss:$16 sps:$4 sm:$0xff]   ;;  %139 = vmatprep.subr.bf16.mxu1 %v236_v2  ;;  %v240_v5 = vld [vmem:[%s310_s1 + $0x24] ss:$16 sps:$4 sm:$0xff]   ;;  %v242_v6 = vld [vmem:[%s310_s1 + $0x2c] ss:$16 sps:$4 sm:$0xff]  }
   0x3   :  { %97 = vmatpush1.bf16.msra.mxu0 %v238_v3  ;;  %140 = vmatpush1.bf16.msra.mxu1 %v239_v4  ;;  %v244_v7 = vld [vmem:[%s310_s1 + $0x20] ss:$16 sps:$4 sm:$0xff]   ;;  %v245_v8 = vld [vmem:[%s310_s1 + $0x28] ss:$16 sps:$4 sm:$0xff]   ;;  %v28_v11 = vshrl.u32 %v27_v10, 7 }
   0x4   :  { %98 = vmatprep.subr.bf16.mxu0 %v240_v5  ;;  %141 = vmatprep.subr.bf16.mxu1 %v242_v6  ;;  %v246_v9 = vld [vmem:[%s311_s0] sm:$0xff]  }
   0x5   :  { %v29_v12 = vsub.s32 0, %v28_v11  ;;  %v37_v13 = vsub.s32 2, %v28_v11  ;;  %v25_v14 = vld [vmem:[%s312_s2] sm:$0xf]  ;;  %v33_v15 = vsub.s32 1, %v28_v11  ;;  %v41_v16 = vsub.s32 3, %v28_v11 }
   0x7   :  { %99 = vmatpush1.bf16.msra.mxu0 %v244_v7  ;;  %142 = vmatpush1.bf16.msra.mxu1 %v245_v8  ;;  %v30_v17 = vrot.slane %v25_v14, %v29_v12  ;;  %v38_v18 = vrot.slane %v25_v14, %v37_v13  ;;  %v34_v19 = vrot.slane %v25_v14, %v33_v15 }
   0x8   :  { %v42_v20 = vrot.slane %v25_v14, %v41_v16 }
   0xa   :  { %223 = vmatmul.mubr.msk.bf16.vlgmr.msra.gmra.mrb[0].mxu0 %vm92_vm0, %v246_v9  ;;  %224 = vmatmul.mubr.msk.bf16.vlgmr.msra.gmra.mrb[0].mxu1 %vm92_vm0, %v246_v9 }
  0xdd   :  { %v130_v21 = vpop.f32.mrb[0].mxu0  ;;  %v173_v22 = vpop.f32.mrb[0].mxu1 }
  0xde   :  { %v131_v23 = vadd.f32 %v130_v21, %v30_v17  ;;  %v174_v24 = vadd.f32 %v173_v22, %v38_v18  ;;  %v132_v25 = vpop.f32.mrb[1].mxu0  ;;  %v175_v26 = vpop.f32.mrb[1].mxu1 }
  0xdf   :  { %v133_v27 = vadd.f32 %v132_v25, %v34_v19  ;;  %v176_v28 = vadd.f32 %v175_v26, %v42_v20  ;;  %v134_v29 = vpop.f32.mrb[2].mxu0  ;;  %v177_v30 = vpop.f32.mrb[2].mxu1 }
  0xe0   :  { %v135_v31 = vadd.f32 %v134_v29, %v30_v17  ;;  %v178_v32 = vadd.f32 %v177_v30, %v38_v18  ;;  %v136_v33 = vpop.f32.mrb[3].mxu0  ;;  %v179_v34 = vpop.f32.mrb[3].mxu1 }
  0xe1   :  { %v229_v35 = vpack.c.bf16 %v133_v27, %v131_v23  ;;  %v230_v36 = vpack.c.bf16 %v176_v28, %v174_v24  ;;  %v137_v37 = vadd.f32 %v136_v33, %v34_v19  ;;  %v180_v38 = vadd.f32 %v179_v34, %v42_v20 }
  0xe3   :  { %206 = vst [vmem:[%s313_s3] sm:$0xff] %v229_v35  ;;  %207 = vst [vmem:[%s313_s3 + $0x8] sm:$0xff] %v230_v36  ;;  %v231_v39 = vpack.c.bf16 %v137_v37, %v135_v31  ;;  %v232_v40 = vpack.c.bf16 %v180_v38, %v178_v32 }
  0xe5   :  { %208 = vst [vmem:[%s313_s3 + $0x10] sm:$0xff] %v231_v39  ;;  %209 = vst [vmem:[%s313_s3 + $0x18] sm:$0xff] %v232_v40 }

// kernel: rnn_forward.5
= control target key start
LH: loop header
LB: loop body
LE: loop exit
PB: predicated region body
PF: predicated region fallthrough
CT: control target
= control target key end

     0   :  { %v265_v2 = vmov 0   ;;  %s355_s0 = inlined_call_operand.vmem [shape: bf16[16,128], index: 0, kind: input, shape index: {}]   ;;  %s356_s1 = inlined_call_operand.vmem [shape: bf16[128,256], index: 1, kind: input, shape index: {}]   ;;  %s357_s2 = inlined_call_operand.vmem [shape: f32[1,256], index: 2, kind: input, shape index: {}]   ;;  %s358_s3 = inlined_call_operand.hbm [shape: f32[16,256], index: 3, kind: output, shape index: {}]  }
   0x1   :  { %v216_v0 = vld [vmem:[%s356_s1 + $0x4] ss:$8 sps:$4 sm:$0xff]   ;;  %v218_v1 = vld [vmem:[%s356_s1] ss:$8 sps:$4 sm:$0xff]   ;;  %164 = vmatprep.mubr.bf16.mxu0 %v265_v2  ;;  %v219_v3 = vld [vmem:[%s356_s1 + $0x14] ss:$8 sps:$4 sm:$0xff]  }
   0x2   :  { %132 = vmatprep.subr.bf16.mxu0 %v216_v0  ;;  %v221_v4 = vld [vmem:[%s356_s1 + $0x10] ss:$8 sps:$4 sm:$0xff]   ;;  %v222_v5 = vld [vmem:[%s356_s1 + $0x24] ss:$8 sps:$4 sm:$0xff]   ;;  %v224_v6 = vld [vmem:[%s356_s1 + $0x20] ss:$8 sps:$4 sm:$0xff]  }
   0x3   :  { %133 = vmatpush1.bf16.msra.mxu0 %v218_v1  ;;  %v225_v7 = vld [vmem:[%s356_s1 + $0x34] ss:$8 sps:$4 sm:$0xff]   ;;  %v227_v8 = vld [vmem:[%s356_s1 + $0x30] ss:$8 sps:$4 sm:$0xff]   ;;  %v228_v9 = vld [vmem:[%s356_s1 + $0x44] ss:$8 sps:$4 sm:$0xff]  }
   0x4   :  { %134 = vmatprep.subr.bf16.mxu0 %v219_v3 }
   0x7   :  { %135 = vmatpush1.bf16.msra.mxu0 %v221_v4 }
   0x8   :  { %136 = vmatprep.subr.bf16.mxu0 %v222_v5 }
   0xb   :  { %137 = vmatpush1.bf16.msra.mxu0 %v224_v6 }
   0xc   :  { %138 = vmatprep.subr.bf16.mxu0 %v225_v7 }
   0xd   :  { %8 = vsyncpa [#allocation3], 0  ;;  %v230_v10 = vld [vmem:[%s356_s1 + $0x40] ss:$8 sps:$4 sm:$0xff]   ;;  %v231_v11 = vld [vmem:[%s356_s1 + $0x54] ss:$8 sps:$4 sm:$0xff]   ;;  %v36_v18 = vlaneseq }
   0xe   :  { %v233_v12 = vld [vmem:[%s356_s1 + $0x50] ss:$8 sps:$4 sm:$0xff]   ;;  %v234_v13 = vld [vmem:[%s356_s1 + $0x64] ss:$8 sps:$4 sm:$0xff]   ;;  %v236_v14 = vld [vmem:[%s356_s1 + $0x60] ss:$8 sps:$4 sm:$0xff]  }
   0xf   :  { %139 = vmatpush1.bf16.msra.mxu0 %v227_v8  ;;  %v237_v15 = vld [vmem:[%s356_s1 + $0x74] ss:$8 sps:$4 sm:$0xff]   ;;  %v239_v16 = vld [vmem:[%s356_s1 + $0x70] ss:$8 sps:$4 sm:$0xff]   ;;  %v240_v17 = vld [vmem:[%s355_s0] sm:$0xff]   ;;  %v37_v19 = vshrl.u32 %v36_v18, 7 }
  0x10   :  { %140 = vmatprep.subr.bf16.mxu0 %v228_v9  ;;  %v34_v21 = vld [vmem:[%s357_s2] sm:$0x3]  ;;  %s266_s21 = smov [#allocation2]  }
  0x11   :  { %v38_v20 = vsub.s32 0, %v37_v19  ;;  %v42_v22 = vsub.s32 1, %v37_v19  ;;  %s184_s1 = sshll.u32 %s266_s21, 4  ;;  %s185_s1 = int_to_ptr.vmem [resolvable:$true] %s184_s1 }
  0x12   :  { %s241_s0 = scalar_lea.vmem %s185_s1, 512  ;;  %p246_p1 = scmp.lt.s32.totalorder %s185_s1, %s185_s1 }
  0x13   :  { %141 = vmatpush1.bf16.msra.mxu0 %v230_v10  ;;  %v39_v23 = vrot.slane %v34_v21, %v38_v20  ;;  %v43_v24 = vrot.slane %v34_v21, %v42_v22  ;;  %p242_p0 = scmp.ne.s32.totalorder %s185_s1, %s241_s0  ;;  %p247_p2 = scmp.lt.s32.totalorder %s241_s0, %s241_s0 }
  0x14   :  { %142 = vmatprep.subr.bf16.mxu0 %v231_v11 }
  0x15   :  { %p248_p3 = por %p247_p2, %p246_p1 }
  0x17   :  { %143 = vmatpush1.bf16.msra.mxu0 %v233_v12  ;;  %p249_p4 = pnand %p248_p3, %p242_p0 }
  0x18   :  { %144 = vmatprep.subr.bf16.mxu0 %v234_v13 }
  0x1b   :  { %145 = vmatpush1.bf16.msra.mxu0 %v236_v14 }
  0x1c   :  { %146 = vmatprep.subr.bf16.mxu0 %v237_v15 }
  0x1f   :  { %147 = vmatpush1.bf16.msra.mxu0 %v239_v16 }
  0x22   :  { %165 = vmatmul.mubr.bf16.vlgmr.msra.gmra.mrb[0].mxu0 %v240_v17 }
  0xf5   :  { %v166_v25 = vpop.f32.mrb[0].mxu0 }
  0xf6   :  { %v167_v26 = vadd.f32 %v166_v25, %v39_v23  ;;  %v168_v27 = vpop.f32.mrb[1].mxu0 }
  0xf7   :  { %v169_v28 = vadd.f32 %v168_v27, %v43_v24  ;;  %v170_v29 = vpop.f32.mrb[2].mxu0 }
  0xf8   :  { %175 = vst [vmem:[#allocation2] sm:$0xff] %v167_v26  ;;  %v171_v30 = vadd.f32 %v170_v29, %v39_v23  ;;  %v172_v31 = vpop.f32.mrb[3].mxu0 }
  0xf9   :  { %176 = vst [vmem:[#allocation2 + $0x8] sm:$0xff] %v169_v28  ;;  %v173_v32 = vadd.f32 %v172_v31, %v43_v24 }
  0xfa   :  { %177 = vst [vmem:[#allocation2 + $0x10] sm:$0xff] %v171_v30 }
  0xfb   :  { %178 = vst [vmem:[#allocation2 + $0x18] sm:$0xff] %v173_v32 }
  0xfc   :  { %252 = shalt.err (!%p249_p4)
}
  0xfd   :  { %s253_s23 = scalar_lea.hbm %s358_s3, 512 }
  0xfe   :  { %p254_p5 = scmp.ne.s32.totalorder %s358_s3, %s253_s23  ;;  %p257_p6 = scmp.lt.u32.totalorder %s253_s23, %s358_s3 }
 0x100   :  { %p259_p7 = pnand %p257_p6, %p254_p5 }
 0x102   :  { %262 = shalt.err (!%p259_p7)
}
 0x103   :  { %s267_s28 = smov 256   ;;  %s268_s29 = smov 16  }
 0x104   :  { %190 = dma.vmem_to_hbm [thread:$0]  %s185_s1, 512, %s358_s3, [#allocation3], %s267_s28, %s267_s28, %s268_s29  }
 0x105   :  { %263 = dma.done.wait [#allocation3], 512  }
 0x106   :  { %264 = vsyncadd [#allocation3], 4294966784 }
 0x107   :  { %194 = vsyncpa [#allocation3], 1 }

// kernel: rnn_forward.4
= control target key start
LH: loop header
LB: loop body
LE: loop exit
PB: predicated region body
PF: predicated region fallthrough
CT: control target
= control target key end

     0   :  { %v2218_v1 = vmov 0   ;;  %vm396_vm0 = vcmask 1040384   ;;  %vm397_vm1 = vsmask.f32 256  ;;  %vm422_vm3 = vcmask 1041409   ;;  %s3127_s1 = inlined_call_operand.vmem [shape: bf16[128,512], index: 1, kind: input, shape index: {}]   ;;  %s3128_s2 = inlined_call_operand.vmem [shape: f32[2,128], index: 2, kind: input, shape index: {}]   ;;  %s3129_s3 = inlined_call_operand.vmem [shape: f32[2,128], index: 3, kind: input, shape index: {}]   ;;  %s3130_s0 = inlined_call_operand.vmem [shape: bf16[2,8,512], index: 0, kind: input, shape index: {}]   ;;  %s3131_s4 = inlined_call_operand.vmem [shape: bf16[2,8,128], index: 4, kind: output, shape index: {0}]   ;;  %s3132_s6 = inlined_call_operand.vmem [shape: f32[2,128], index: 6, kind: output, shape index: {2}]   ;;  %s3133_s5 = inlined_call_operand.vmem [shape: f32[2,128], index: 5, kind: output, shape index: {1}]  }
   0x1   :  { %v2257_v0 = vld [vmem:[%s3127_s1 + $0x4] ss:$16 sps:$4 sm:$0xff]   ;;  %268 = vmatprep.mubr.bf16.mxu0 %v2218_v1  ;;  %309 = vmatprep.mubr.bf16.mxu1 %v2218_v1  ;;  %v2264_v2 = vld [vmem:[%s3127_s1] ss:$16 sps:$4 sm:$0xff]   ;;  %v2287_v6 = vld [vmem:[%s3127_s1 + $0xc] ss:$16 sps:$4 sm:$0xff]  }
   0x2   :  { %236 = vmatprep.subr.bf16.mxu0 %v2257_v0  ;;  %v2270_v3 = vld [vmem:[%s3127_s1 + $0x24] ss:$16 sps:$4 sm:$0xff]   ;;  %v2276_v4 = vld [vmem:[%s3127_s1 + $0x20] ss:$16 sps:$4 sm:$0xff]   ;;  %v2292_v7 = vld [vmem:[%s3127_s1 + $0x8] ss:$16 sps:$4 sm:$0xff]   ;;  %277 = vmatprep.subr.bf16.mxu1 %v2287_v6 }
   0x3   :  { %237 = vmatpush1.bf16.msra.mxu0 %v2264_v2  ;;  %v2282_v5 = vld [vmem:[%s3127_s1 + $0x44] ss:$16 sps:$4 sm:$0xff]   ;;  %v2298_v8 = vld [vmem:[%s3127_s1 + $0x40] ss:$16 sps:$4 sm:$0xff]   ;;  %278 = vmatpush1.bf16.msra.mxu1 %v2292_v7  ;;  %v2311_v10 = vld [vmem:[%s3127_s1 + $0x2c] ss:$16 sps:$4 sm:$0xff]  }
   0x4   :  { %238 = vmatprep.subr.bf16.mxu0 %v2270_v3  ;;  %v2305_v9 = vld [vmem:[%s3127_s1 + $0x64] ss:$16 sps:$4 sm:$0xff]   ;;  %v2316_v11 = vld [vmem:[%s3127_s1 + $0x28] ss:$16 sps:$4 sm:$0xff]   ;;  %279 = vmatprep.subr.bf16.mxu1 %v2311_v10  ;;  %v2323_v12 = vld [vmem:[%s3127_s1 + $0x60] ss:$16 sps:$4 sm:$0xff]  }
   0x5   :  { %v2328_v13 = vld [vmem:[%s3127_s1 + $0x84] ss:$16 sps:$4 sm:$0xff]   ;;  %v2333_v14 = vld [vmem:[%s3127_s1 + $0x4c] ss:$16 sps:$4 sm:$0xff]   ;;  %v2340_v15 = vld [vmem:[%s3127_s1 + $0x48] ss:$16 sps:$4 sm:$0xff]  }
   0x6   :  { %v2346_v16 = vld [vmem:[%s3127_s1 + $0x6c] ss:$16 sps:$4 sm:$0xff]   ;;  %v2352_v17 = vld [vmem:[%s3127_s1 + $0x80] ss:$16 sps:$4 sm:$0xff]   ;;  %v2358_v18 = vld [vmem:[%s3127_s1 + $0xa4] ss:$16 sps:$4 sm:$0xff]  }
   0x7   :  { %239 = vmatpush1.bf16.msra.mxu0 %v2276_v4  ;;  %280 = vmatpush1.bf16.msra.mxu1 %v2316_v11  ;;  %v2364_v19 = vld [vmem:[%s3127_s1 + $0x68] ss:$16 sps:$4 sm:$0xff]   ;;  %v2370_v20 = vld [vmem:[%s3127_s1 + $0x8c] ss:$16 sps:$4 sm:$0xff]   ;;  %v25_v21 = vld [vmem:[%s3128_s2] sm:$0x3] }
   0x8   :  { %240 = vmatprep.subr.bf16.mxu0 %v2282_v5  ;;  %281 = vmatprep.subr.bf16.mxu1 %v2333_v14  ;;  %v2378_v22 = vld [vmem:[%s3127_s1 + $0xa0] ss:$16 sps:$4 sm:$0xff]   ;;  %26 = vst [vmem:[#allocation2] sm:$0x3] %v25_v21  ;;  %v2384_v23 = vld [vmem:[%s3127_s1 + $0xc4] ss:$16 sps:$4 sm:$0xff]   ;;  %vm398_vm2 = vmand %vm396_vm0, %vm397_vm1 }
   0x9   :  { %v2391_v24 = vld [vmem:[%s3127_s1 + $0x88] ss:$16 sps:$4 sm:$0xff]   ;;  %v2397_v25 = vld [vmem:[%s3127_s1 + $0xac] ss:$16 sps:$4 sm:$0xff]   ;;  %v2403_v26 = vld [vmem:[%s3127_s1 + $0xc0] ss:$16 sps:$4 sm:$0xff]  }
   0xa   :  { %v2409_v27 = vld [vmem:[%s3127_s1 + $0xe4] ss:$16 sps:$4 sm:$0xff]   ;;  %v2415_v28 = vld [vmem:[%s3127_s1 + $0xa8] ss:$16 sps:$4 sm:$0xff]   ;;  %v2421_v29 = vld [vmem:[%s3127_s1 + $0xcc] ss:$16 sps:$4 sm:$0xff]  }
   0xb   :  { %241 = vmatpush1.bf16.msra.mxu0 %v2298_v8  ;;  %282 = vmatpush1.bf16.msra.mxu1 %v2340_v15  ;;  %v2427_v30 = vld [vmem:[%s3127_s1 + $0xe0] ss:$16 sps:$4 sm:$0xff]   ;;  %v2434_v32 = vld [vmem:[%s3127_s1 + $0xc8] ss:$16 sps:$4 sm:$0xff]   ;;  %v2440_v33 = vld [vmem:[%s3127_s1 + $0xec] ss:$16 sps:$4 sm:$0xff]  }
   0xc   :  { %242 = vmatprep.subr.bf16.mxu0 %v2305_v9  ;;  %283 = vmatprep.subr.bf16.mxu1 %v2346_v16  ;;  %v2447_v35 = vld [vmem:[%s3127_s1 + $0xe8] ss:$16 sps:$4 sm:$0xff]   ;;  %v27_v36 = vld [vmem:[%s3129_s3] sm:$0x3]  ;;  %v65_v38 = vld [vmem:[%s3130_s0 + $0x10] sm:$0x11] }
   0xd   :  { %28 = vst [vmem:[#allocation3] sm:$0x3] %v27_v36  ;;  %v63_v37 = vld [vmem:[%s3130_s0] sm:$0x11]  ;;  %v71_v41 = vunpack.c.l.bf16 %v65_v38  ;;  %v72_v43 = vunpack.c.h.bf16 %v65_v38  ;;  %v64_v44 = vld [vmem:[%s3130_s0 + $0x8] sm:$0x11] }
   0xe   :  { %v67_v39 = vunpack.c.l.bf16 %v63_v37  ;;  %v68_v40 = vunpack.c.h.bf16 %v63_v37  ;;  %v66_v51 = vld [vmem:[%s3130_s0 + $0x18] sm:$0x11]  ;;  %v70_v55 = vunpack.c.h.bf16 %v64_v44  ;;  %v69_v62 = vunpack.c.l.bf16 %v64_v44 }
   0xf   :  { %243 = vmatpush1.bf16.msra.mxu0 %v2323_v12  ;;  %284 = vmatpush1.bf16.msra.mxu1 %v2364_v19  ;;  %v61_v31 = vld [vmem:[#allocation2] sm:$0x3]  ;;  %v74_v60 = vunpack.c.h.bf16 %v66_v51  ;;  %v73_v37 = vunpack.c.l.bf16 %v66_v51  ;;  %vm588_vm4 = vsmask.f32 7938  ;;  %vm783_vm6 = vsmask.f32 1280 }
  0x10   :  { %244 = vmatprep.subr.bf16.mxu0 %v2328_v13  ;;  %285 = vmatprep.subr.bf16.mxu1 %v2370_v20  ;;  %v75_v34 = vpack.c.bf16 %v61_v31, %v61_v31  ;;  %vm589_vm5 = vmand %vm396_vm0, %vm588_vm4  ;;  %vm978_vm8 = vsmask.f32 7942  ;;  %vm1173_vm10 = vcmask 1042434   ;;  %vm1174_vm11 = vsmask.f32 2304 }
  0x11   :  { %vm784_vm7 = vmand %vm422_vm3, %vm783_vm6  ;;  %vm1369_vm13 = vsmask.f32 7946  ;;  %vm1564_vm15 = vcmask 1043459   ;;  %vm1565_vm0 = vsmask.f32 3328 }
  0x12   :  { %vm979_vm9 = vmand %vm422_vm3, %vm978_vm8 }
  0x13   :  { %245 = vmatpush1.bf16.msra.mxu0 %v2352_v17  ;;  %286 = vmatpush1.bf16.msra.mxu1 %v2391_v24  ;;  %vm1175_vm12 = vmand %vm1173_vm10, %vm1174_vm11 }
  0x14   :  { %246 = vmatprep.subr.bf16.mxu0 %v2358_v18  ;;  %287 = vmatprep.subr.bf16.mxu1 %v2397_v25  ;;  %vm1370_vm14 = vmand %vm1173_vm10, %vm1369_vm13 }
  0x15   :  { %vm1566_vm1 = vmand %vm1564_vm15, %vm1565_vm0 }
  0x17   :  { %247 = vmatpush1.bf16.msra.mxu0 %v2378_v22  ;;  %288 = vmatpush1.bf16.msra.mxu1 %v2415_v28 }
  0x18   :  { %248 = vmatprep.subr.bf16.mxu0 %v2384_v23  ;;  %289 = vmatprep.subr.bf16.mxu1 %v2421_v29 }
  0x1b   :  { %249 = vmatpush1.bf16.msra.mxu0 %v2403_v26  ;;  %290 = vmatpush1.bf16.msra.mxu1 %v2434_v32 }
  0x1c   :  { %250 = vmatprep.subr.bf16.mxu0 %v2409_v27  ;;  %291 = vmatprep.subr.bf16.mxu1 %v2440_v33 }
  0x1f   :  { %251 = vmatpush1.bf16.msra.mxu0 %v2427_v30  ;;  %292 = vmatpush1.bf16.msra.mxu1 %v2447_v35 }
  0x20   :  { %426 = vmatprep.subr.bf16.mxu0 %v2257_v0  ;;  %467 = vmatprep.subr.bf16.mxu1 %v2287_v6 }
  0x22   :  { %269 = vmatmul.mubr.bf16.vlgmr.msra.gmra.mrb[0].mxu0 %v75_v34  ;;  %310 = vmatmul.mubr.bf16.vlgmr.msra.gmra.mrb[0].mxu1 %v75_v34 }
  0x23   :  { %427 = vmatpush1.bf16.msra.mxu0 %v2264_v2  ;;  %458 = vmatprep.mubr.bf16.mxu0 %v2218_v1 }
  0x24   :  { %428 = vmatprep.subr.bf16.mxu0 %v2270_v3  ;;  %468 = vmatpush1.bf16.msra.mxu1 %v2292_v7 }
  0x25   :  { %469 = vmatprep.subr.bf16.mxu1 %v2311_v10  ;;  %499 = vmatprep.mubr.bf16.mxu1 %v2218_v1 }
  0x27   :  { %429 = vmatpush1.bf16.msra.mxu0 %v2276_v4 }
  0x28   :  { %430 = vmatprep.subr.bf16.mxu0 %v2282_v5  ;;  %470 = vmatpush1.bf16.msra.mxu1 %v2316_v11 }
  0x29   :  { %471 = vmatprep.subr.bf16.mxu1 %v2333_v14 }
  0x2b   :  { %431 = vmatpush1.bf16.msra.mxu0 %v2298_v8 }
  0x2c   :  { %432 = vmatprep.subr.bf16.mxu0 %v2305_v9  ;;  %472 = vmatpush1.bf16.msra.mxu1 %v2340_v15 }
  0x2d   :  { %473 = vmatprep.subr.bf16.mxu1 %v2346_v16 }
  0x2f   :  { %433 = vmatpush1.bf16.msra.mxu0 %v2323_v12 }
  0x30   :  { %434 = vmatprep.subr.bf16.mxu0 %v2328_v13  ;;  %474 = vmatpush1.bf16.msra.mxu1 %v2364_v19 }
  0x31   :  { %475 = vmatprep.subr.bf16.mxu1 %v2370_v20 }
  0x33   :  { %435 = vmatpush1.bf16.msra.mxu0 %v2352_v17 }
  0x34   :  { %436 = vmatprep.subr.bf16.mxu0 %v2358_v18  ;;  %476 = vmatpush1.bf16.msra.mxu1 %v2391_v24 }
  0x35   :  { %477 = vmatprep.subr.bf16.mxu1 %v2397_v25 }
  0x37   :  { %437 = vmatpush1.bf16.msra.mxu0 %v2378_v22 }
  0x38   :  { %438 = vmatprep.subr.bf16.mxu0 %v2384_v23  ;;  %478 = vmatpush1.bf16.msra.mxu1 %v2415_v28 }
  0x39   :  { %479 = vmatprep.subr.bf16.mxu1 %v2421_v29 }
  0x3b   :  { %439 = vmatpush1.bf16.msra.mxu0 %v2403_v26 }
  0x3c   :  { %440 = vmatprep.subr.bf16.mxu0 %v2409_v27  ;;  %480 = vmatpush1.bf16.msra.mxu1 %v2434_v32 }
  0x3d   :  { %481 = vmatprep.subr.bf16.mxu1 %v2440_v33 }
  0x3f   :  { %441 = vmatpush1.bf16.msra.mxu0 %v2427_v30 }
  0x40   :  { %616 = vmatprep.subr.bf16.mxu0 %v2257_v0  ;;  %482 = vmatpush1.bf16.msra.mxu1 %v2447_v35 }
  0x41   :  { %657 = vmatprep.subr.bf16.mxu1 %v2287_v6 }
  0xf5   :  { %v270_v42 = vpop.f32.mrb[0].mxu0  ;;  %v311_v59 = vpop.f32.mrb[0].mxu1 }
  0xf6   :  { %v322_v45 = vrot.slane %v270_v42, 1  ;;  %v334_v46 = vadd.f32 %v270_v42, %v67_v39  ;;  %v272_v47 = vpop.f32.mrb[1].mxu0  ;;  %v313_v63 = vpop.f32.mrb[1].mxu1  ;;  %v324_v38 = vrot.slane %v311_v59, 1 }
  0xf7   :  { %v323_v48 = vrot.slane %v272_v47, 1  ;;  %v335_v49 = vadd.f32 %v272_v47, %v68_v40  ;;  %v274_v50 = vpop.f32.mrb[2].mxu0  ;;  %v325_v21 = vrot.slane %v313_v63, 1  ;;  %v337_v31 = vadd.f32 %v313_v63, %v70_v55  ;;  %v315_v34 = vpop.f32.mrb[2].mxu1 }
  0xf8   :  { %v338_v52 = vadd.f32 %v322_v45, %v71_v41  ;;  %v1833_v53 = vmul.f32 -1.442695, %v334_v46  ;;  %v275_v54 = vpop.f32.mrb[3].mxu0  ;;  %v316_v36 = vpop.f32.mrb[3].mxu1  ;;  %v336_v40 = vadd.f32 %v311_v59, %v69_v62 }
  0xf9   :  { %v339_v56 = vadd.f32 %v323_v48, %v72_v43  ;;  %v1835_v57 = vmul.f32 -1.442695, %v335_v49  ;;  %v341_v39 = vadd.f32 %v325_v21, %v74_v60  ;;  %v1837_v41 = vmul.f32 -1.442695, %v337_v31  ;;  %v62_v54 = vld [vmem:[#allocation3] sm:$0x3] }
  0xfa   :  { %1930 = vpow2.f32 %v1833_v53  ;;  %v1834_v58 = vmul.f32 -1.442695, %v338_v52  ;;  %v340_v43 = vadd.f32 %v324_v38, %v73_v37 }
  0xfb   :  { %1932 = vpow2.f32 %v1835_v57  ;;  %v1836_v61 = vmul.f32 -1.442695, %v339_v56  ;;  %v1838_v42 = vmul.f32 -1.442695, %v341_v39 }
  0xfc   :  { %1934 = vpow2.f32 %v1834_v58  ;;  %v381_v58 = vrot.slane %v62_v54, 1 }
  0xfd   :  { %1936 = vpow2.f32 %v1836_v61 }
  0xfe   :  { %1938 = vtanh.f32 %v336_v40 }
  0xff   :  { %1940 = vpow2.f32 %v1837_v41 }
 0x100   :  { %1942 = vpow2.f32 %v1838_v42 }
 0x101   :  { %1944 = vtanh.f32 %v340_v43 }
 0x104   :  { %v1931_v45 = vpop.eup %1930 }
 0x105   :  { %v1933_v46 = vpop.eup %1932  ;;  %v348_v47 = vadd.f32 1.0, %v1931_v45  ;;  %v399_v45 = vld [vmem:[%s3131_s4] sm:$0x1] }
 0x106   :  { %v1935_v44 = vpop.eup %1934  ;;  %v360_v48 = vadd.f32 1.0, %v1933_v46 }
 0x107   :  { %v1937_v49 = vpop.eup %1936  ;;  %v349_v50 = vadd.f32 1.0, %v1935_v44  ;;  %1946 = vrcp.f32 %v348_v47  ;;  %v402_v44 = vld [vmem:[%s3131_s4 + $0x4] sm:$0x1] }
 0x108   :  { %v361_v52 = vadd.f32 1.0, %v1937_v49  ;;  %1948 = vrcp.f32 %v360_v48  ;;  %v1939_v51 = vpop.eup %1938 }
 0x109   :  { %1950 = vrcp.f32 %v349_v50  ;;  %v1941_v53 = vpop.eup %1940 }
 0x10a   :  { %1952 = vrcp.f32 %v361_v52  ;;  %v1943_v55 = vpop.eup %1942  ;;  %v374_v59 = vadd.f32 1.0, %v1941_v53 }
 0x10b   :  { %v1945_v56 = vpop.eup %1944  ;;  %v375_v62 = vadd.f32 1.0, %v1943_v55 }
 0x10c   :  { %1954 = vrcp.f32 %v374_v59 }
 0x10d   :  { %1956 = vrcp.f32 %v375_v62 }
 0x111   :  { %v1947_v57 = vpop.eup %1946 }
 0x112   :  { %v1949_v60 = vpop.eup %1948  ;;  %v386_v61 = vmul.f32 %v1947_v57, %v1939_v51  ;;  %v405_v57 = vld [vmem:[%s3130_s0] sm:$0x11] }
 0x113   :  { %v1951_v63 = vpop.eup %1950  ;;  %v384_v21 = vmul.f32 %v1949_v60, %v62_v54  ;;  %v409_v60 = vunpack.c.l.bf16 %v405_v57 }
 0x114   :  { %v1953_v31 = vpop.eup %1952  ;;  %v387_v34 = vmul.f32 %v1951_v63, %v1945_v56  ;;  %v407_v56 = vld [vmem:[%s3130_s0 + $0x10] sm:$0x11]  ;;  %v410_v63 = vunpack.c.h.bf16 %v405_v57 }
 0x115   :  { %v385_v36 = vmul.f32 %v1953_v31, %v381_v58  ;;  %v2502_v37 = vadd.f32 %v386_v61, %v384_v21  ;;  %v413_v58 = vunpack.c.l.bf16 %v407_v56  ;;  %v414_v59 = vunpack.c.h.bf16 %v407_v56 }
 0x116   :  { %v1955_v39 = vpop.eup %1954 }
 0x117   :  { %v2504_v38 = vadd.f32 %v387_v34, %v385_v36  ;;  %1958 = vtanh.f32 %v2502_v37  ;;  %v1957_v40 = vpop.eup %1956  ;;  %v406_v34 = vld [vmem:[%s3130_s0 + $0x8] sm:$0x11] }
 0x119   :  { %1960 = vtanh.f32 %v2504_v38 }
 0x121   :  { %v1959_v41 = vpop.eup %1958 }
 0x122   :  { %v392_v42 = vmul.f32 %v1959_v41, %v1955_v39 }
 0x123   :  { %v1961_v43 = vpop.eup %1960 }
 0x124   :  { %v393_v46 = vmul.f32 %v1961_v43, %v1957_v40  ;;  %v394_v47 = vpack.c.bf16 %v392_v42, %v392_v42  ;;  %v408_v40 = vld [vmem:[%s3130_s0 + $0x18] sm:$0x11] }
 0x125   :  { %v415_v56 = vunpack.c.l.bf16 %v408_v40 }
 0x126   :  { %v395_v48 = vpack.c.bf16 %v393_v46, %v393_v46  ;;  %v400_v49 = vsel %vm398_vm2, %v394_v47, %v399_v45  ;;  %v419_v51 = vunpack.c.l.b16 %v394_v47 }
 0x127   :  { %401 = vst [vmem:[%s3131_s4] sm:$0x1] %v400_v49 }
 0x128   :  { %v403_v50 = vsel %vm398_vm2, %v395_v48, %v402_v44  ;;  %v420_v52 = vunpack.c.l.b16 %v395_v48  ;;  %vm1760_vm2 = vsmask.f32 7950 }
 0x129   :  { %404 = vst [vmem:[%s3131_s4 + $0x4] sm:$0x1] %v403_v50  ;;  %v412_v50 = vunpack.c.h.bf16 %v406_v34 }
 0x12a   :  { %v421_v53 = vrot.slane %v420_v52, 7 }
 0x12c   :  { %v423_v54 = vsel %vm422_vm3, %v421_v53, %v419_v51 }
 0x12d   :  { %v424_v55 = vpack.c.b16 %v423_v54, %v423_v54  ;;  %v416_v54 = vunpack.c.h.bf16 %v408_v40 }
 0x12f   :  { %459 = vmatmul.mubr.bf16.vlgmr.msra.gmra.mrb[4].mxu0 %v424_v55  ;;  %500 = vmatmul.mubr.bf16.vlgmr.msra.gmra.mrb[4].mxu1 %v424_v55 }
 0x130   :  { %617 = vmatpush1.bf16.msra.mxu0 %v2264_v2  ;;  %658 = vmatpush1.bf16.msra.mxu1 %v2292_v7 }
 0x131   :  { %618 = vmatprep.subr.bf16.mxu0 %v2270_v3  ;;  %659 = vmatprep.subr.bf16.mxu1 %v2311_v10 }
 0x132   :  { %648 = vmatprep.mubr.bf16.mxu0 %v2218_v1  ;;  %689 = vmatprep.mubr.bf16.mxu1 %v2218_v1 }
 0x134   :  { %619 = vmatpush1.bf16.msra.mxu0 %v2276_v4  ;;  %660 = vmatpush1.bf16.msra.mxu1 %v2316_v11 }
 0x135   :  { %620 = vmatprep.subr.bf16.mxu0 %v2282_v5  ;;  %661 = vmatprep.subr.bf16.mxu1 %v2333_v14 }
 0x138   :  { %621 = vmatpush1.bf16.msra.mxu0 %v2298_v8  ;;  %662 = vmatpush1.bf16.msra.mxu1 %v2340_v15 }
 0x139   :  { %622 = vmatprep.subr.bf16.mxu0 %v2305_v9  ;;  %663 = vmatprep.subr.bf16.mxu1 %v2346_v16 }
 0x13c   :  { %623 = vmatpush1.bf16.msra.mxu0 %v2323_v12  ;;  %664 = vmatpush1.bf16.msra.mxu1 %v2364_v19 }
 0x13d   :  { %624 = vmatprep.subr.bf16.mxu0 %v2328_v13  ;;  %665 = vmatprep.subr.bf16.mxu1 %v2370_v20 }
 0x140   :  { %625 = vmatpush1.bf16.msra.mxu0 %v2352_v17  ;;  %666 = vmatpush1.bf16.msra.mxu1 %v2391_v24 }
 0x141   :  { %626 = vmatprep.subr.bf16.mxu0 %v2358_v18  ;;  %667 = vmatprep.subr.bf16.mxu1 %v2397_v25 }
 0x144   :  { %627 = vmatpush1.bf16.msra.mxu0 %v2378_v22  ;;  %668 = vmatpush1.bf16.msra.mxu1 %v2415_v28 }
 0x145   :  { %628 = vmatprep.subr.bf16.mxu0 %v2384_v23  ;;  %669 = vmatprep.subr.bf16.mxu1 %v2421_v29 }
 0x148   :  { %629 = vmatpush1.bf16.msra.mxu0 %v2403_v26  ;;  %670 = vmatpush1.bf16.msra.mxu1 %v2434_v32 }
 0x149   :  { %630 = vmatprep.subr.bf16.mxu0 %v2409_v27  ;;  %671 = vmatprep.subr.bf16.mxu1 %v2440_v33 }
 0x14c   :  { %631 = vmatpush1.bf16.msra.mxu0 %v2427_v30  ;;  %672 = vmatpush1.bf16.msra.mxu1 %v2447_v35 }
 0x14d   :  { %812 = vmatprep.subr.bf16.mxu0 %v2257_v0  ;;  %853 = vmatprep.subr.bf16.mxu1 %v2287_v6 }
 0x202   :  { %v460_v61 = vpop.f32.mrb[4].mxu0  ;;  %v501_v62 = vpop.f32.mrb[4].mxu1 }
 0x203   :  { %v512_v21 = vrot.slane %v460_v61, 7  ;;  %v528_v31 = vadd.f32 %v460_v61, %v413_v58  ;;  %v462_v36 = vpop.f32.mrb[5].mxu0  ;;  %v503_v39 = vpop.f32.mrb[5].mxu1  ;;  %v514_v61 = vrot.slane %v501_v62, 7 }
 0x204   :  { %v513_v41 = vrot.slane %v462_v36, 7  ;;  %v529_v42 = vadd.f32 %v462_v36, %v414_v59  ;;  %v464_v43 = vpop.f32.mrb[6].mxu0  ;;  %v505_v45 = vpop.f32.mrb[6].mxu1  ;;  %v515_v52 = vrot.slane %v503_v39, 7  ;;  %v531_v58 = vadd.f32 %v503_v39, %v416_v54 }
 0x205   :  { %v524_v46 = vadd.f32 %v512_v21, %v409_v60  ;;  %v1840_v47 = vmul.f32 -1.442695, %v528_v31  ;;  %v465_v44 = vpop.f32.mrb[7].mxu0  ;;  %v506_v48 = vpop.f32.mrb[7].mxu1  ;;  %v411_v59 = vunpack.c.l.bf16 %v406_v34  ;;  %v530_v60 = vadd.f32 %v501_v62, %v415_v56 }
 0x206   :  { %v525_v49 = vadd.f32 %v513_v41, %v410_v63  ;;  %v1842_v53 = vmul.f32 -1.442695, %v529_v42  ;;  %v527_v57 = vadd.f32 %v515_v52, %v412_v50  ;;  %v1844_v31 = vmul.f32 -1.442695, %v531_v58 }
 0x207   :  { %v1839_v51 = vmul.f32 -1.442695, %v524_v46  ;;  %1962 = vpow2.f32 %v1840_v47  ;;  %v526_v63 = vadd.f32 %v514_v61, %v411_v59  ;;  %v572_v52 = vrot.slane %v2502_v37, 7 }
 0x208   :  { %v1841_v55 = vmul.f32 -1.442695, %v525_v49  ;;  %v1843_v21 = vmul.f32 -1.442695, %v527_v57 }
 0x209   :  { %1964 = vpow2.f32 %v1839_v51 }
 0x20a   :  { %1966 = vpow2.f32 %v1841_v55  ;;  %v573_v55 = vrot.slane %v2504_v38, 7 }
 0x20b   :  { %1968 = vpow2.f32 %v1842_v53 }
 0x20c   :  { %1970 = vtanh.f32 %v530_v60 }
 0x20d   :  { %1972 = vpow2.f32 %v1843_v21 }
 0x20e   :  { %1974 = vpow2.f32 %v1844_v31 }
 0x211   :  { %v1963_v36 = vpop.eup %1962 }
 0x212   :  { %v539_v41 = vadd.f32 1.0, %v1963_v36 }
 0x213   :  { %v1965_v43 = vpop.eup %1964 }
 0x214   :  { %v1967_v42 = vpop.eup %1966  ;;  %v538_v45 = vadd.f32 1.0, %v1965_v43  ;;  %1976 = vrcp.f32 %v539_v41 }
 0x215   :  { %v1969_v40 = vpop.eup %1968  ;;  %1978 = vtanh.f32 %v526_v63  ;;  %v550_v46 = vadd.f32 1.0, %v1967_v42  ;;  %v590_v42 = vld [vmem:[%s3131_s4] sm:$0x1] }
 0x216   :  { %1980 = vrcp.f32 %v538_v45  ;;  %v551_v39 = vadd.f32 1.0, %v1969_v40  ;;  %v1971_v62 = vpop.eup %1970  ;;  %v593_v40 = vld [vmem:[%s3131_s4 + $0x4] sm:$0x1] }
 0x217   :  { %1982 = vrcp.f32 %v550_v46  ;;  %v1973_v34 = vpop.eup %1972 }
 0x218   :  { %1984 = vrcp.f32 %v551_v39  ;;  %v1975_v47 = vpop.eup %1974  ;;  %v564_v51 = vadd.f32 1.0, %v1973_v34 }
 0x219   :  { %v565_v56 = vadd.f32 1.0, %v1975_v47 }
 0x21a   :  { %1986 = vrcp.f32 %v564_v51 }
 0x21b   :  { %1988 = vrcp.f32 %v565_v56 }
 0x21e   :  { %v1977_v44 = vpop.eup %1976 }
 0x21f   :  { %v1979_v48 = vpop.eup %1978  ;;  %v579_v49 = vmul.f32 %v1977_v44, %v1971_v62 }
 0x220   :  { %v1981_v50 = vpop.eup %1980 }
 0x221   :  { %v1983_v53 = vpop.eup %1982  ;;  %v578_v54 = vmul.f32 %v1981_v50, %v1979_v48 }
 0x222   :  { %v1985_v57 = vpop.eup %1984  ;;  %v576_v58 = vmul.f32 %v1983_v53, %v572_v52 }
 0x223   :  { %v577_v59 = vmul.f32 %v1985_v57, %v573_v55 }
 0x224   :  { %v2570_v61 = vadd.f32 %v578_v54, %v576_v58  ;;  %v1987_v37 = vpop.eup %1986  ;;  %v597_v58 = vld [vmem:[%s3130_s0 + $0x8] sm:$0x22] }
 0x225   :  { %v2572_v60 = vadd.f32 %v579_v49, %v577_v59  ;;  %v1989_v21 = vpop.eup %1988 }
 0x226   :  { %1990 = vtanh.f32 %v2570_v61 }
 0x227   :  { %1992 = vtanh.f32 %v2572_v60 }
 0x230   :  { %v1991_v31 = vpop.eup %1990 }
 0x231   :  { %v1993_v36 = vpop.eup %1992  ;;  %v584_v38 = vmul.f32 %v1991_v31, %v1987_v37 }
 0x232   :  { %v585_v63 = vmul.f32 %v1993_v36, %v1989_v21  ;;  %v599_v21 = vld [vmem:[%s3130_s0 + $0x18] sm:$0x22] }
 0x233   :  { %v586_v41 = vpack.c.bf16 %v584_v38, %v584_v38 }
 0x234   :  { %v587_v43 = vpack.c.bf16 %v585_v63, %v585_v63 }
 0x235   :  { %v591_v45 = vsel %vm589_vm5, %v586_v41, %v590_v42  ;;  %v610_v46 = vunpack.c.l.b16 %v586_v41  ;;  %v603_v42 = vunpack.c.h.bf16 %v597_v58 }
 0x236   :  { %592 = vst [vmem:[%s3131_s4] sm:$0x1] %v591_v45  ;;  %v594_v39 = vsel %vm589_vm5, %v587_v43, %v593_v40  ;;  %v611_v62 = vunpack.c.l.b16 %v587_v43  ;;  %v607_v40 = vunpack.c.h.bf16 %v599_v21 }
 0x237   :  { %595 = vst [vmem:[%s3131_s4 + $0x4] sm:$0x1] %v594_v39  ;;  %v612_v34 = vrot.slane %v610_v46, 1  ;;  %v602_v39 = vunpack.c.l.bf16 %v597_v58 }
 0x239   :  { %v613_v47 = vsel %vm422_vm3, %v611_v62, %v612_v34  ;;  %v606_v34 = vunpack.c.l.bf16 %v599_v21 }
 0x23a   :  { %v614_v44 = vpack.c.b16 %v613_v47, %v613_v47 }
 0x23c   :  { %649 = vmatmul.mubr.bf16.vlgmr.msra.gmra.mrb[8].mxu0 %v614_v44  ;;  %690 = vmatmul.mubr.bf16.vlgmr.msra.gmra.mrb[8].mxu1 %v614_v44 }
 0x23d   :  { %813 = vmatpush1.bf16.msra.mxu0 %v2264_v2  ;;  %854 = vmatpush1.bf16.msra.mxu1 %v2292_v7  ;;  %v596_v2 = vld [vmem:[%s3130_s0] sm:$0x22] }
 0x23e   :  { %814 = vmatprep.subr.bf16.mxu0 %v2270_v3  ;;  %855 = vmatprep.subr.bf16.mxu1 %v2311_v10  ;;  %v598_v3 = vld [vmem:[%s3130_s0 + $0x10] sm:$0x22]  ;;  %v601_v48 = vunpack.c.h.bf16 %v596_v2 }
 0x23f   :  { %844 = vmatprep.mubr.bf16.mxu0 %v2218_v1  ;;  %885 = vmatprep.mubr.bf16.mxu1 %v2218_v1  ;;  %v605_v49 = vunpack.c.h.bf16 %v598_v3 }
 0x241   :  { %815 = vmatpush1.bf16.msra.mxu0 %v2276_v4  ;;  %856 = vmatpush1.bf16.msra.mxu1 %v2316_v11  ;;  %v600_v4 = vunpack.c.l.bf16 %v596_v2 }
 0x242   :  { %816 = vmatprep.subr.bf16.mxu0 %v2282_v5  ;;  %857 = vmatprep.subr.bf16.mxu1 %v2333_v14  ;;  %v604_v5 = vunpack.c.l.bf16 %v598_v3 }
 0x245   :  { %817 = vmatpush1.bf16.msra.mxu0 %v2298_v8  ;;  %858 = vmatpush1.bf16.msra.mxu1 %v2340_v15 }
 0x246   :  { %818 = vmatprep.subr.bf16.mxu0 %v2305_v9  ;;  %859 = vmatprep.subr.bf16.mxu1 %v2346_v16 }
 0x249   :  { %819 = vmatpush1.bf16.msra.mxu0 %v2323_v12  ;;  %860 = vmatpush1.bf16.msra.mxu1 %v2364_v19 }
 0x24a   :  { %820 = vmatprep.subr.bf16.mxu0 %v2328_v13  ;;  %861 = vmatprep.subr.bf16.mxu1 %v2370_v20 }
 0x24d   :  { %821 = vmatpush1.bf16.msra.mxu0 %v2352_v17  ;;  %862 = vmatpush1.bf16.msra.mxu1 %v2391_v24 }
 0x24e   :  { %822 = vmatprep.subr.bf16.mxu0 %v2358_v18  ;;  %863 = vmatprep.subr.bf16.mxu1 %v2397_v25 }
 0x251   :  { %823 = vmatpush1.bf16.msra.mxu0 %v2378_v22  ;;  %864 = vmatpush1.bf16.msra.mxu1 %v2415_v28 }
 0x252   :  { %824 = vmatprep.subr.bf16.mxu0 %v2384_v23  ;;  %865 = vmatprep.subr.bf16.mxu1 %v2421_v29 }
 0x255   :  { %825 = vmatpush1.bf16.msra.mxu0 %v2403_v26  ;;  %866 = vmatpush1.bf16.msra.mxu1 %v2434_v32 }
 0x256   :  { %826 = vmatprep.subr.bf16.mxu0 %v2409_v27  ;;  %867 = vmatprep.subr.bf16.mxu1 %v2440_v33 }
 0x259   :  { %827 = vmatpush1.bf16.msra.mxu0 %v2427_v30  ;;  %868 = vmatpush1.bf16.msra.mxu1 %v2447_v35 }
 0x25a   :  { %1007 = vmatprep.subr.bf16.mxu0 %v2257_v0  ;;  %1048 = vmatprep.subr.bf16.mxu1 %v2287_v6 }
 0x30f   :  { %v650_v8 = vpop.f32.mrb[8].mxu0  ;;  %v691_v9 = vpop.f32.mrb[8].mxu1 }
 0x310   :  { %v702_v50 = vrot.slane %v650_v8, 6  ;;  %v706_v52 = vrot.slane %v650_v8, 7  ;;  %v652_v51 = vpop.f32.mrb[9].mxu0  ;;  %v693_v0 = vpop.f32.mrb[9].mxu1  ;;  %v704_v62 = vrot.slane %v691_v9, 6  ;;  %v708_v47 = vrot.slane %v691_v9, 7 }
 0x311   :  { %v703_v53 = vrot.slane %v652_v51, 6  ;;  %v707_v6 = vrot.slane %v652_v51, 7  ;;  %v654_v54 = vpop.f32.mrb[10].mxu0  ;;  %v695_v55 = vpop.f32.mrb[10].mxu1  ;;  %v705_v45 = vrot.slane %v693_v0, 6  ;;  %v709_v46 = vrot.slane %v693_v0, 7 }
 0x312   :  { %v718_v56 = vadd.f32 %v702_v50, %v600_v4  ;;  %v722_v57 = vadd.f32 %v706_v52, %v604_v5  ;;  %v655_v59 = vpop.f32.mrb[11].mxu0  ;;  %v696_v37 = vpop.f32.mrb[11].mxu1  ;;  %v720_v3 = vadd.f32 %v704_v62, %v602_v39  ;;  %v724_v4 = vadd.f32 %v708_v47, %v606_v34  ;;  %v785_v47 = vld [vmem:[%s3131_s4] sm:$0x2] }
 0x313   :  { %v719_v31 = vadd.f32 %v703_v53, %v601_v48  ;;  %v723_v36 = vadd.f32 %v707_v6, %v605_v49  ;;  %v721_v44 = vadd.f32 %v705_v45, %v603_v42  ;;  %v725_v2 = vadd.f32 %v709_v46, %v607_v40 }
 0x314   :  { %v1845_v38 = vmul.f32 -1.442695, %v718_v56  ;;  %v1846_v63 = vmul.f32 -1.442695, %v722_v57  ;;  %v766_v37 = vrot.slane %v2570_v61, 7 }
 0x315   :  { %v1847_v41 = vmul.f32 -1.442695, %v719_v31  ;;  %v1848_v43 = vmul.f32 -1.442695, %v723_v36  ;;  %v1849_v5 = vmul.f32 -1.442695, %v721_v44 }
 0x316   :  { %1994 = vpow2.f32 %v1845_v38  ;;  %v1850_v8 = vmul.f32 -1.442695, %v725_v2  ;;  %v767_v38 = vrot.slane %v2572_v60, 7  ;;  %v788_v2 = vld [vmem:[%s3131_s4 + $0x4] sm:$0x2] }
 0x317   :  { %1996 = vpow2.f32 %v1846_v63 }
 0x318   :  { %1998 = vpow2.f32 %v1847_v41 }
 0x319   :  { %2000 = vpow2.f32 %v1848_v43 }
 0x31a   :  { %2002 = vtanh.f32 %v720_v3 }
 0x31b   :  { %2004 = vtanh.f32 %v724_v4 }
 0x31c   :  { %2006 = vpow2.f32 %v1849_v5 }
 0x31d   :  { %2008 = vpow2.f32 %v1850_v8 }
 0x320   :  { %v1995_v48 = vpop.eup %1994 }
 0x321   :  { %v1997_v49 = vpop.eup %1996  ;;  %v732_v50 = vadd.f32 1.0, %v1995_v48 }
 0x322   :  { %v1999_v52 = vpop.eup %1998  ;;  %v733_v51 = vadd.f32 1.0, %v1997_v49 }
 0x323   :  { %v2001_v0 = vpop.eup %2000  ;;  %2010 = vrcp.f32 %v732_v50  ;;  %v744_v9 = vadd.f32 1.0, %v1999_v52 }
 0x324   :  { %2012 = vrcp.f32 %v733_v51  ;;  %v745_v53 = vadd.f32 1.0, %v2001_v0  ;;  %v2003_v6 = vpop.eup %2002  ;;  %v2661_v0 = vld [vmem:[%s3127_s1] ss:$16 sps:$4 sm:$0xff]  }
 0x325   :  { %2014 = vrcp.f32 %v744_v9  ;;  %v2005_v54 = vpop.eup %2004  ;;  %v2668_v9 = vld [vmem:[%s3127_s1 + $0x24] ss:$16 sps:$4 sm:$0xff]  }
 0x326   :  { %2016 = vrcp.f32 %v745_v53  ;;  %v2007_v55 = vpop.eup %2006  ;;  %v2677_v53 = vld [vmem:[%s3127_s1 + $0x20] ss:$16 sps:$4 sm:$0xff]  }
 0x327   :  { %v2009_v56 = vpop.eup %2008  ;;  %v758_v21 = vadd.f32 1.0, %v2007_v55  ;;  %v794_v55 = vld [vmem:[%s3130_s0 + $0x18] sm:$0x22] }
 0x328   :  { %v759_v63 = vadd.f32 1.0, %v2009_v56 }
 0x329   :  { %2018 = vrcp.f32 %v758_v21 }
 0x32a   :  { %2020 = vrcp.f32 %v759_v63 }
 0x32d   :  { %v2011_v57 = vpop.eup %2010 }
 0x32e   :  { %v2013_v58 = vpop.eup %2012  ;;  %v772_v59 = vmul.f32 %v2011_v57, %v2003_v6 }
 0x32f   :  { %v2015_v31 = vpop.eup %2014  ;;  %v773_v36 = vmul.f32 %v2013_v58, %v2005_v54 }
 0x330   :  { %v2017_v41 = vpop.eup %2016  ;;  %v770_v43 = vmul.f32 %v2015_v31, %v766_v37 }
 0x331   :  { %v771_v42 = vmul.f32 %v2017_v41, %v767_v38  ;;  %v802_v38 = vunpack.c.h.bf16 %v794_v55 }
 0x332   :  { %v2638_v45 = vadd.f32 %v772_v59, %v770_v43 }
 0x333   :  { %v2640_v40 = vadd.f32 %v773_v36, %v771_v42  ;;  %v2019_v61 = vpop.eup %2018  ;;  %v801_v42 = vunpack.c.l.bf16 %v794_v55 }
 0x334   :  { %2022 = vtanh.f32 %v2638_v45  ;;  %v2021_v46 = vpop.eup %2020 }
 0x335   :  { %2024 = vtanh.f32 %v2640_v40 }
 0x33e   :  { %v2023_v39 = vpop.eup %2022 }
 0x33f   :  { %v2025_v62 = vpop.eup %2024  ;;  %v778_v60 = vmul.f32 %v2023_v39, %v2019_v61 }
 0x340   :  { %v779_v34 = vmul.f32 %v2025_v62, %v2021_v46 }
 0x341   :  { %v780_v44 = vpack.c.bf16 %v778_v60, %v778_v60 }
 0x342   :  { %v781_v3 = vpack.c.bf16 %v779_v34, %v779_v34 }
 0x343   :  { %v786_v4 = vsel %vm784_vm7, %v780_v44, %v785_v47  ;;  %v805_v5 = vunpack.c.l.b16 %v780_v44 }
 0x344   :  { %787 = vst [vmem:[%s3131_s4] sm:$0x2] %v786_v4  ;;  %v789_v8 = vsel %vm784_vm7, %v781_v3, %v788_v2  ;;  %v806_v48 = vunpack.c.l.b16 %v781_v3 }
 0x345   :  { %790 = vst [vmem:[%s3131_s4 + $0x4] sm:$0x2] %v789_v8  ;;  %v807_v49 = vrot.slane %v805_v5, 2 }
 0x346   :  { %v808_v50 = vrot.slane %v806_v48, 1 }
 0x348   :  { %v809_v52 = vsel %vm422_vm3, %v808_v50, %v807_v49 }
 0x349   :  { %v810_v51 = vpack.c.b16 %v809_v52, %v809_v52 }
 0x34b   :  { %845 = vmatmul.mubr.bf16.vlgmr.msra.gmra.mrb[12].mxu0 %v810_v51  ;;  %886 = vmatmul.mubr.bf16.vlgmr.msra.gmra.mrb[12].mxu1 %v810_v51  ;;  %v980_v55 = vld [vmem:[%s3131_s4] sm:$0x2] }
 0x34c   :  { %1008 = vmatpush1.bf16.msra.mxu0 %v2661_v0  ;;  %1049 = vmatpush1.bf16.msra.mxu1 %v2292_v7  ;;  %v2684_v7 = vld [vmem:[%s3127_s1 + $0x44] ss:$16 sps:$4 sm:$0xff]  }
 0x34d   :  { %1009 = vmatprep.subr.bf16.mxu0 %v2668_v9  ;;  %1050 = vmatprep.subr.bf16.mxu1 %v2311_v10  ;;  %v2691_v10 = vld [vmem:[%s3127_s1 + $0x40] ss:$16 sps:$4 sm:$0xff]  }
 0x34e   :  { %1039 = vmatprep.mubr.bf16.mxu0 %v2218_v1  ;;  %1080 = vmatprep.mubr.bf16.mxu1 %v2218_v1 }
 0x350   :  { %1010 = vmatpush1.bf16.msra.mxu0 %v2677_v53  ;;  %1051 = vmatpush1.bf16.msra.mxu1 %v2316_v11  ;;  %v2698_v11 = vld [vmem:[%s3127_s1 + $0x64] ss:$16 sps:$4 sm:$0xff]  }
 0x351   :  { %1011 = vmatprep.subr.bf16.mxu0 %v2684_v7  ;;  %1052 = vmatprep.subr.bf16.mxu1 %v2333_v14  ;;  %v791_v14 = vld [vmem:[%s3130_s0] sm:$0x22] }
 0x354   :  { %1012 = vmatpush1.bf16.msra.mxu0 %v2691_v10  ;;  %1053 = vmatpush1.bf16.msra.mxu1 %v2340_v15  ;;  %v793_v15 = vld [vmem:[%s3130_s0 + $0x10] sm:$0x22] }
 0x355   :  { %1013 = vmatprep.subr.bf16.mxu0 %v2698_v11  ;;  %1054 = vmatprep.subr.bf16.mxu1 %v2346_v16  ;;  %v795_v16 = vunpack.c.l.bf16 %v791_v14 }
 0x358   :  { %1014 = vmatpush1.bf16.msra.mxu0 %v2323_v12  ;;  %1055 = vmatpush1.bf16.msra.mxu1 %v2364_v19  ;;  %v2723_v12 = vld [vmem:[%s3127_s1 + $0x4] ss:$16 sps:$4 sm:$0xff]  }
 0x359   :  { %1015 = vmatprep.subr.bf16.mxu0 %v2328_v13  ;;  %1056 = vmatprep.subr.bf16.mxu1 %v2370_v20  ;;  %v2729_v13 = vld [vmem:[%s3127_s1 + $0xc] ss:$16 sps:$4 sm:$0xff]   ;;  %v796_v20 = vunpack.c.h.bf16 %v791_v14 }
 0x35c   :  { %1016 = vmatpush1.bf16.msra.mxu0 %v2352_v17  ;;  %1057 = vmatpush1.bf16.msra.mxu1 %v2391_v24  ;;  %v799_v17 = vunpack.c.l.bf16 %v793_v15 }
 0x35d   :  { %1017 = vmatprep.subr.bf16.mxu0 %v2358_v18  ;;  %1058 = vmatprep.subr.bf16.mxu1 %v2397_v25 }
 0x360   :  { %1018 = vmatpush1.bf16.msra.mxu0 %v2378_v22  ;;  %1059 = vmatpush1.bf16.msra.mxu1 %v2415_v28  ;;  %v800_v22 = vunpack.c.h.bf16 %v793_v15 }
 0x361   :  { %1019 = vmatprep.subr.bf16.mxu0 %v2384_v23  ;;  %1060 = vmatprep.subr.bf16.mxu1 %v2421_v29 }
 0x364   :  { %1020 = vmatpush1.bf16.msra.mxu0 %v2403_v26  ;;  %1061 = vmatpush1.bf16.msra.mxu1 %v2434_v32 }
 0x365   :  { %1021 = vmatprep.subr.bf16.mxu0 %v2409_v27  ;;  %1062 = vmatprep.subr.bf16.mxu1 %v2440_v33 }
 0x368   :  { %1022 = vmatpush1.bf16.msra.mxu0 %v2427_v30  ;;  %1063 = vmatpush1.bf16.msra.mxu1 %v2447_v35  ;;  %v792_v35 = vld [vmem:[%s3130_s0 + $0x8] sm:$0x22] }
 0x369   :  { %1203 = vmatprep.subr.bf16.mxu0 %v2723_v12  ;;  %1244 = vmatprep.subr.bf16.mxu1 %v2729_v13  ;;  %v798_v31 = vunpack.c.h.bf16 %v792_v35  ;;  %v797_v41 = vunpack.c.l.bf16 %v792_v35 }
 0x41e   :  { %v846_v18 = vpop.f32.mrb[12].mxu0  ;;  %v887_v19 = vpop.f32.mrb[12].mxu1 }
 0x41f   :  { %v898_v23 = vrot.slane %v846_v18, 5  ;;  %v902_v24 = vrot.slane %v846_v18, 6  ;;  %v848_v25 = vpop.f32.mrb[13].mxu0  ;;  %v889_v26 = vpop.f32.mrb[13].mxu1  ;;  %v900_v43 = vrot.slane %v887_v19, 5  ;;  %v904_v61 = vrot.slane %v887_v19, 6 }
 0x420   :  { %v899_v27 = vrot.slane %v848_v25, 5  ;;  %v903_v28 = vrot.slane %v848_v25, 6  ;;  %v850_v29 = vpop.f32.mrb[14].mxu0  ;;  %v891_v30 = vpop.f32.mrb[14].mxu1  ;;  %v901_v36 = vrot.slane %v889_v26, 5  ;;  %v905_v63 = vrot.slane %v889_v26, 6 }
 0x421   :  { %v914_v32 = vadd.f32 %v898_v23, %v795_v16  ;;  %v918_v33 = vadd.f32 %v902_v24, %v799_v17  ;;  %v851_v6 = vpop.f32.mrb[15].mxu0  ;;  %v892_v54 = vpop.f32.mrb[15].mxu1  ;;  %v916_v62 = vadd.f32 %v900_v43, %v797_v41  ;;  %v920_v60 = vadd.f32 %v904_v61, %v801_v42  ;;  %v2777_v41 = vld [vmem:[%s3127_s1 + $0x2c] ss:$16 sps:$4 sm:$0xff]   ;;  %v2786_v43 = vld [vmem:[%s3127_s1 + $0x28] ss:$16 sps:$4 sm:$0xff]  }
 0x422   :  { %v915_v56 = vadd.f32 %v899_v27, %v796_v20  ;;  %v919_v57 = vadd.f32 %v903_v28, %v800_v22  ;;  %v917_v46 = vadd.f32 %v901_v36, %v798_v31  ;;  %v921_v39 = vadd.f32 %v905_v63, %v802_v38  ;;  %v2770_v63 = vld [vmem:[%s3127_s1 + $0x8] ss:$16 sps:$4 sm:$0xff]   ;;  %v2793_v42 = vld [vmem:[%s3127_s1 + $0x4c] ss:$16 sps:$4 sm:$0xff]  }
 0x423   :  { %v1851_v58 = vmul.f32 -1.442695, %v914_v32  ;;  %v1852_v59 = vmul.f32 -1.442695, %v918_v33  ;;  %v962_v18 = vrot.slane %v2638_v45, 7  ;;  %v963_v23 = vrot.slane %v2640_v40, 7 }
 0x424   :  { %v1853_v37 = vmul.f32 -1.442695, %v915_v56  ;;  %v1854_v21 = vmul.f32 -1.442695, %v919_v57  ;;  %v1855_v34 = vmul.f32 -1.442695, %v917_v46 }
 0x425   :  { %2026 = vpow2.f32 %v1851_v58  ;;  %v1856_v47 = vmul.f32 -1.442695, %v921_v39  ;;  %v983_v57 = vld [vmem:[%s3131_s4 + $0x4] sm:$0x2]  ;;  %v2800_v61 = vld [vmem:[%s3127_s1 + $0x48] ss:$16 sps:$4 sm:$0xff]  }
 0x426   :  { %2028 = vpow2.f32 %v1852_v59  ;;  %v2807_v46 = vld [vmem:[%s3127_s1 + $0x6c] ss:$16 sps:$4 sm:$0xff]   ;;  %v2813_v39 = vld [vmem:[%s3127_s1 + $0x60] ss:$16 sps:$4 sm:$0xff]  }
 0x427   :  { %2030 = vpow2.f32 %v1853_v37 }
 0x428   :  { %2032 = vpow2.f32 %v1854_v21 }
 0x429   :  { %2034 = vtanh.f32 %v916_v62  ;;  %v2819_v62 = vld [vmem:[%s3127_s1 + $0x68] ss:$16 sps:$4 sm:$0xff]  }
 0x42a   :  { %2036 = vtanh.f32 %v920_v60  ;;  %v2825_v60 = vld [vmem:[%s3127_s1 + $0x84] ss:$16 sps:$4 sm:$0xff]  }
 0x42b   :  { %2038 = vpow2.f32 %v1855_v34  ;;  %v2831_v34 = vld [vmem:[%s3127_s1 + $0x8c] ss:$16 sps:$4 sm:$0xff]  }
 0x42c   :  { %2040 = vpow2.f32 %v1856_v47  ;;  %v2837_v47 = vld [vmem:[%s3127_s1 + $0x80] ss:$16 sps:$4 sm:$0xff]  }
 0x42f   :  { %v2027_v44 = vpop.eup %2026 }
 0x430   :  { %v2029_v2 = vpop.eup %2028  ;;  %v928_v3 = vadd.f32 1.0, %v2027_v44  ;;  %v2843_v44 = vld [vmem:[%s3127_s1 + $0x88] ss:$16 sps:$4 sm:$0xff]  }
 0x431   :  { %v2031_v4 = vpop.eup %2030  ;;  %v929_v5 = vadd.f32 1.0, %v2029_v2  ;;  %v2849_v2 = vld [vmem:[%s3127_s1 + $0xa4] ss:$16 sps:$4 sm:$0xff]  }
 0x432   :  { %v2033_v8 = vpop.eup %2032  ;;  %2042 = vrcp.f32 %v928_v3  ;;  %v940_v48 = vadd.f32 1.0, %v2031_v4  ;;  %v2855_v3 = vld [vmem:[%s3127_s1 + $0xac] ss:$16 sps:$4 sm:$0xff]   ;;  %v2861_v4 = vld [vmem:[%s3127_s1 + $0xa0] ss:$16 sps:$4 sm:$0xff]  }
 0x433   :  { %2044 = vrcp.f32 %v929_v5  ;;  %v941_v49 = vadd.f32 1.0, %v2033_v8  ;;  %v2035_v50 = vpop.eup %2034  ;;  %v2867_v5 = vld [vmem:[%s3127_s1 + $0xa8] ss:$16 sps:$4 sm:$0xff]   ;;  %v2873_v8 = vld [vmem:[%s3127_s1 + $0xc4] ss:$16 sps:$4 sm:$0xff]  }
 0x434   :  { %2046 = vrcp.f32 %v940_v48  ;;  %v2037_v52 = vpop.eup %2036  ;;  %v2879_v48 = vld [vmem:[%s3127_s1 + $0xcc] ss:$16 sps:$4 sm:$0xff]  }
 0x435   :  { %2048 = vrcp.f32 %v941_v49  ;;  %v2039_v51 = vpop.eup %2038  ;;  %v2885_v49 = vld [vmem:[%s3127_s1 + $0xc0] ss:$16 sps:$4 sm:$0xff]  }
 0x436   :  { %v2041_v14 = vpop.eup %2040  ;;  %v954_v19 = vadd.f32 1.0, %v2039_v51  ;;  %v2903_v51 = vld [vmem:[%s3127_s1 + $0xec] ss:$16 sps:$4 sm:$0xff]  }
 0x437   :  { %v955_v24 = vadd.f32 1.0, %v2041_v14  ;;  %v2909_v14 = vld [vmem:[%s3127_s1 + $0xe0] ss:$16 sps:$4 sm:$0xff]  }
 0x438   :  { %2050 = vrcp.f32 %v954_v19 }
 0x439   :  { %2052 = vrcp.f32 %v955_v24 }
 0x43c   :  { %v2043_v15 = vpop.eup %2042 }
 0x43d   :  { %v2045_v16 = vpop.eup %2044  ;;  %v968_v17 = vmul.f32 %v2043_v15, %v2035_v50  ;;  %v2891_v50 = vld [vmem:[%s3127_s1 + $0xc8] ss:$16 sps:$4 sm:$0xff]  }
 0x43e   :  { %v2047_v20 = vpop.eup %2046  ;;  %v969_v22 = vmul.f32 %v2045_v16, %v2037_v52  ;;  %v2897_v52 = vld [vmem:[%s3127_s1 + $0xe4] ss:$16 sps:$4 sm:$0xff]   ;;  %v2915_v15 = vld [vmem:[%s3127_s1 + $0xe8] ss:$16 sps:$4 sm:$0xff]  }
 0x43f   :  { %v2049_v25 = vpop.eup %2048  ;;  %v966_v26 = vmul.f32 %v2047_v20, %v962_v18  ;;  %v986_v16 = vld [vmem:[%s3130_s0] sm:$0x44] }
 0x440   :  { %v967_v27 = vmul.f32 %v2049_v25, %v963_v23  ;;  %v990_v18 = vunpack.c.l.bf16 %v986_v16  ;;  %v991_v23 = vunpack.c.h.bf16 %v986_v16 }
 0x441   :  { %v2746_v28 = vadd.f32 %v968_v17, %v966_v26  ;;  %v988_v17 = vld [vmem:[%s3130_s0 + $0x10] sm:$0x44] }
 0x442   :  { %v2748_v29 = vadd.f32 %v969_v22, %v967_v27  ;;  %v2051_v45 = vpop.eup %2050  ;;  %v994_v19 = vunpack.c.l.bf16 %v988_v17  ;;  %v995_v24 = vunpack.c.h.bf16 %v988_v17 }
 0x443   :  { %2054 = vtanh.f32 %v2746_v28  ;;  %v2053_v30 = vpop.eup %2052 }
 0x444   :  { %2056 = vtanh.f32 %v2748_v29 }
 0x44d   :  { %v2055_v32 = vpop.eup %2054 }
 0x44e   :  { %v2057_v33 = vpop.eup %2056  ;;  %v974_v40 = vmul.f32 %v2055_v32, %v2051_v45 }
 0x44f   :  { %v975_v35 = vmul.f32 %v2057_v33, %v2053_v30 }
 0x450   :  { %v976_v6 = vpack.c.bf16 %v974_v40, %v974_v40 }
 0x451   :  { %v977_v54 = vpack.c.bf16 %v975_v35, %v975_v35 }
 0x452   :  { %v981_v56 = vsel %vm979_vm9, %v976_v6, %v980_v55  ;;  %v1000_v58 = vunpack.c.l.b16 %v976_v6 }
 0x453   :  { %982 = vst [vmem:[%s3131_s4] sm:$0x2] %v981_v56  ;;  %v984_v59 = vsel %vm979_vm9, %v977_v54, %v983_v57  ;;  %v1001_v37 = vunpack.c.l.b16 %v977_v54  ;;  %v987_v54 = vld [vmem:[%s3130_s0 + $0x8] sm:$0x44]  ;;  %v989_v57 = vld [vmem:[%s3130_s0 + $0x18] sm:$0x44] }
 0x454   :  { %985 = vst [vmem:[%s3131_s4 + $0x4] sm:$0x2] %v984_v59  ;;  %v1002_v21 = vrot.slane %v1000_v58, 3  ;;  %v997_v17 = vunpack.c.h.bf16 %v989_v57 }
 0x455   :  { %v1003_v31 = vrot.slane %v1001_v37, 2 }
 0x457   :  { %v1004_v36 = vsel %vm422_vm3, %v1003_v31, %v1002_v21 }
 0x458   :  { %v1005_v38 = vpack.c.b16 %v1004_v36, %v1004_v36 }
 0x45a   :  { %1040 = vmatmul.mubr.bf16.vlgmr.msra.gmra.mrb[16].mxu0 %v1005_v38  ;;  %1081 = vmatmul.mubr.bf16.vlgmr.msra.gmra.mrb[16].mxu1 %v1005_v38  ;;  %v993_v38 = vunpack.c.h.bf16 %v987_v54 }
 0x45b   :  { %1204 = vmatpush1.bf16.msra.mxu0 %v2661_v0  ;;  %1245 = vmatpush1.bf16.msra.mxu1 %v2770_v63 }
 0x45c   :  { %1205 = vmatprep.subr.bf16.mxu0 %v2668_v9  ;;  %1246 = vmatprep.subr.bf16.mxu1 %v2777_v41 }
 0x45d   :  { %1235 = vmatprep.mubr.bf16.mxu0 %v2218_v1  ;;  %1276 = vmatprep.mubr.bf16.mxu1 %v2218_v1 }
 0x45f   :  { %1206 = vmatpush1.bf16.msra.mxu0 %v2677_v53  ;;  %1247 = vmatpush1.bf16.msra.mxu1 %v2786_v43 }
 0x460   :  { %1207 = vmatprep.subr.bf16.mxu0 %v2684_v7  ;;  %1248 = vmatprep.subr.bf16.mxu1 %v2793_v42 }
 0x463   :  { %1208 = vmatpush1.bf16.msra.mxu0 %v2691_v10  ;;  %1249 = vmatpush1.bf16.msra.mxu1 %v2800_v61 }
 0x464   :  { %1209 = vmatprep.subr.bf16.mxu0 %v2698_v11  ;;  %1250 = vmatprep.subr.bf16.mxu1 %v2807_v46 }
 0x467   :  { %1210 = vmatpush1.bf16.msra.mxu0 %v2813_v39  ;;  %1251 = vmatpush1.bf16.msra.mxu1 %v2819_v62 }
 0x468   :  { %1211 = vmatprep.subr.bf16.mxu0 %v2825_v60  ;;  %1252 = vmatprep.subr.bf16.mxu1 %v2831_v34 }
 0x46b   :  { %1212 = vmatpush1.bf16.msra.mxu0 %v2837_v47  ;;  %1253 = vmatpush1.bf16.msra.mxu1 %v2843_v44 }
 0x46c   :  { %1213 = vmatprep.subr.bf16.mxu0 %v2849_v2  ;;  %1254 = vmatprep.subr.bf16.mxu1 %v2855_v3 }
 0x46f   :  { %1214 = vmatpush1.bf16.msra.mxu0 %v2861_v4  ;;  %1255 = vmatpush1.bf16.msra.mxu1 %v2867_v5 }
 0x470   :  { %1215 = vmatprep.subr.bf16.mxu0 %v2873_v8  ;;  %1256 = vmatprep.subr.bf16.mxu1 %v2879_v48 }
 0x473   :  { %1216 = vmatpush1.bf16.msra.mxu0 %v2885_v49  ;;  %1257 = vmatpush1.bf16.msra.mxu1 %v2891_v50 }
 0x474   :  { %1217 = vmatprep.subr.bf16.mxu0 %v2897_v52  ;;  %1258 = vmatprep.subr.bf16.mxu1 %v2903_v51 }
 0x477   :  { %1218 = vmatpush1.bf16.msra.mxu0 %v2909_v14  ;;  %1259 = vmatpush1.bf16.msra.mxu1 %v2915_v15 }
 0x478   :  { %1398 = vmatprep.subr.bf16.mxu0 %v2723_v12  ;;  %1439 = vmatprep.subr.bf16.mxu1 %v2729_v13 }
 0x52d   :  { %v1041_v20 = vpop.f32.mrb[16].mxu0  ;;  %v1082_v22 = vpop.f32.mrb[16].mxu1 }
 0x52e   :  { %v1093_v25 = vrot.slane %v1041_v20, 4  ;;  %v1097_v26 = vrot.slane %v1041_v20, 5  ;;  %v1043_v27 = vpop.f32.mrb[17].mxu0  ;;  %v1084_v45 = vpop.f32.mrb[17].mxu1  ;;  %v1095_v20 = vrot.slane %v1082_v22, 4 }
 0x52f   :  { %v1094_v30 = vrot.slane %v1043_v27, 4  ;;  %v1098_v32 = vrot.slane %v1043_v27, 5  ;;  %v1045_v33 = vpop.f32.mrb[18].mxu0  ;;  %v1086_v40 = vpop.f32.mrb[18].mxu1  ;;  %v1096_v16 = vrot.slane %v1084_v45, 4 }
 0x530   :  { %v1109_v35 = vadd.f32 %v1093_v25, %v990_v18  ;;  %v1113_v6 = vadd.f32 %v1097_v26, %v994_v19  ;;  %v1046_v55 = vpop.f32.mrb[19].mxu0  ;;  %v1087_v56 = vpop.f32.mrb[19].mxu1  ;;  %v1100_v18 = vrot.slane %v1084_v45, 5  ;;  %v992_v19 = vunpack.c.l.bf16 %v987_v54 }
 0x531   :  { %v1110_v58 = vadd.f32 %v1094_v30, %v991_v23  ;;  %v1114_v59 = vadd.f32 %v1098_v32, %v995_v24  ;;  %v996_v25 = vunpack.c.l.bf16 %v989_v57  ;;  %v1099_v26 = vrot.slane %v1082_v22, 5 }
 0x532   :  { %v1857_v37 = vmul.f32 -1.442695, %v1109_v35  ;;  %v1858_v21 = vmul.f32 -1.442695, %v1113_v6  ;;  %v1112_v27 = vadd.f32 %v1096_v16, %v993_v38  ;;  %v1116_v33 = vadd.f32 %v1100_v18, %v997_v17 }
 0x533   :  { %v1859_v31 = vmul.f32 -1.442695, %v1110_v58  ;;  %v1860_v36 = vmul.f32 -1.442695, %v1114_v59  ;;  %v1111_v23 = vadd.f32 %v1095_v20, %v992_v19  ;;  %v1115_v24 = vadd.f32 %v1099_v26, %v996_v25 }
 0x534   :  { %2058 = vpow2.f32 %v1857_v37  ;;  %v1861_v30 = vmul.f32 -1.442695, %v1112_v27  ;;  %v1862_v32 = vmul.f32 -1.442695, %v1116_v33  ;;  %v1157_v38 = vrot.slane %v2746_v28, 7 }
 0x535   :  { %2060 = vpow2.f32 %v1858_v21  ;;  %v1158_v19 = vrot.slane %v2748_v29, 7 }
 0x536   :  { %2062 = vpow2.f32 %v1859_v31 }
 0x537   :  { %2064 = vpow2.f32 %v1860_v36 }
 0x538   :  { %2066 = vtanh.f32 %v1111_v23 }
 0x539   :  { %2068 = vtanh.f32 %v1115_v24 }
 0x53a   :  { %2070 = vpow2.f32 %v1861_v30 }
 0x53b   :  { %2072 = vpow2.f32 %v1862_v32 }
 0x53e   :  { %v2059_v40 = vpop.eup %2058 }
 0x53f   :  { %v2061_v35 = vpop.eup %2060  ;;  %v1123_v6 = vadd.f32 1.0, %v2059_v40 }
 0x540   :  { %v2063_v45 = vpop.eup %2062  ;;  %v1124_v55 = vadd.f32 1.0, %v2061_v35  ;;  %v1176_v35 = vld [vmem:[%s3131_s4] sm:$0x4] }
 0x541   :  { %v2065_v54 = vpop.eup %2064  ;;  %2074 = vrcp.f32 %v1123_v6  ;;  %v1135_v22 = vadd.f32 1.0, %v2063_v45  ;;  %v1179_v45 = vld [vmem:[%s3131_s4 + $0x4] sm:$0x4] }
 0x542   :  { %2076 = vrcp.f32 %v1124_v55  ;;  %v1136_v56 = vadd.f32 1.0, %v2065_v54  ;;  %v2067_v57 = vpop.eup %2066 }
 0x543   :  { %2078 = vrcp.f32 %v1135_v22  ;;  %v2069_v58 = vpop.eup %2068 }
 0x544   :  { %2080 = vrcp.f32 %v1136_v56  ;;  %v2071_v59 = vpop.eup %2070 }
 0x545   :  { %v2073_v37 = vpop.eup %2072  ;;  %v1149_v16 = vadd.f32 1.0, %v2071_v59 }
 0x546   :  { %v1150_v20 = vadd.f32 1.0, %v2073_v37 }
 0x547   :  { %2082 = vrcp.f32 %v1149_v16 }
 0x548   :  { %2084 = vrcp.f32 %v1150_v20 }
 0x54b   :  { %v2075_v21 = vpop.eup %2074 }
 0x54c   :  { %v2077_v31 = vpop.eup %2076  ;;  %v1163_v36 = vmul.f32 %v2075_v21, %v2067_v57 }
 0x54d   :  { %v2079_v17 = vpop.eup %2078  ;;  %v1164_v18 = vmul.f32 %v2077_v31, %v2069_v58  ;;  %v1182_v31 = vld [vmem:[%s3130_s0] sm:$0x44] }
 0x54e   :  { %v2081_v25 = vpop.eup %2080  ;;  %v1161_v26 = vmul.f32 %v2079_v17, %v1157_v38  ;;  %v1186_v38 = vunpack.c.l.bf16 %v1182_v31 }
 0x54f   :  { %v1162_v27 = vmul.f32 %v2081_v25, %v1158_v19  ;;  %v1187_v19 = vunpack.c.h.bf16 %v1182_v31 }
 0x550   :  { %v2934_v33 = vadd.f32 %v1163_v36, %v1161_v26  ;;  %v1184_v36 = vld [vmem:[%s3130_s0 + $0x10] sm:$0x44] }
 0x551   :  { %v2936_v23 = vadd.f32 %v1164_v18, %v1162_v27  ;;  %v2083_v28 = vpop.eup %2082  ;;  %v1190_v16 = vunpack.c.l.bf16 %v1184_v36  ;;  %v1191_v20 = vunpack.c.h.bf16 %v1184_v36 }
 0x552   :  { %2086 = vtanh.f32 %v2934_v33  ;;  %v2085_v24 = vpop.eup %2084 }
 0x553   :  { %2088 = vtanh.f32 %v2936_v23 }
 0x55c   :  { %v2087_v30 = vpop.eup %2086 }
 0x55d   :  { %v2089_v29 = vpop.eup %2088  ;;  %v1169_v32 = vmul.f32 %v2087_v30, %v2083_v28 }
 0x55e   :  { %v1170_v40 = vmul.f32 %v2089_v29, %v2085_v24 }
 0x55f   :  { %v1171_v6 = vpack.c.bf16 %v1169_v32, %v1169_v32 }
 0x560   :  { %v1172_v55 = vpack.c.bf16 %v1170_v40, %v1170_v40  ;;  %v1183_v40 = vld [vmem:[%s3130_s0 + $0x8] sm:$0x44] }
 0x561   :  { %v1177_v54 = vsel %vm1175_vm12, %v1171_v6, %v1176_v35  ;;  %v1196_v22 = vunpack.c.l.b16 %v1171_v6  ;;  %v1188_v36 = vunpack.c.l.bf16 %v1183_v40 }
 0x562   :  { %1178 = vst [vmem:[%s3131_s4] sm:$0x4] %v1177_v54  ;;  %v1180_v56 = vsel %vm1175_vm12, %v1172_v55, %v1179_v45  ;;  %v1197_v57 = vunpack.c.l.b16 %v1172_v55  ;;  %v1185_v45 = vld [vmem:[%s3130_s0 + $0x18] sm:$0x44] }
 0x563   :  { %1181 = vst [vmem:[%s3131_s4 + $0x4] sm:$0x4] %v1180_v56  ;;  %v1198_v58 = vrot.slane %v1196_v22, 4 }
 0x564   :  { %v1199_v59 = vrot.slane %v1197_v57, 3 }
 0x566   :  { %v1200_v37 = vsel %vm422_vm3, %v1199_v59, %v1198_v58  ;;  %v1189_v59 = vunpack.c.h.bf16 %v1183_v40 }
 0x567   :  { %v1201_v21 = vpack.c.b16 %v1200_v37, %v1200_v37 }
 0x569   :  { %1236 = vmatmul.mubr.bf16.vlgmr.msra.gmra.mrb[20].mxu0 %v1201_v21  ;;  %1277 = vmatmul.mubr.bf16.vlgmr.msra.gmra.mrb[20].mxu1 %v1201_v21  ;;  %v1193_v21 = vunpack.c.h.bf16 %v1185_v45 }
 0x56a   :  { %1399 = vmatpush1.bf16.msra.mxu0 %v2661_v0  ;;  %1440 = vmatpush1.bf16.msra.mxu1 %v2770_v63 }
 0x56b   :  { %1400 = vmatprep.subr.bf16.mxu0 %v2668_v9  ;;  %1441 = vmatprep.subr.bf16.mxu1 %v2777_v41 }
 0x56c   :  { %1430 = vmatprep.mubr.bf16.mxu0 %v2218_v1  ;;  %1471 = vmatprep.mubr.bf16.mxu1 %v2218_v1 }
 0x56e   :  { %1401 = vmatpush1.bf16.msra.mxu0 %v2677_v53  ;;  %1442 = vmatpush1.bf16.msra.mxu1 %v2786_v43 }
 0x56f   :  { %1402 = vmatprep.subr.bf16.mxu0 %v2684_v7  ;;  %1443 = vmatprep.subr.bf16.mxu1 %v2793_v42 }
 0x572   :  { %1403 = vmatpush1.bf16.msra.mxu0 %v2691_v10  ;;  %1444 = vmatpush1.bf16.msra.mxu1 %v2800_v61 }
 0x573   :  { %1404 = vmatprep.subr.bf16.mxu0 %v2698_v11  ;;  %1445 = vmatprep.subr.bf16.mxu1 %v2807_v46 }
 0x576   :  { %1405 = vmatpush1.bf16.msra.mxu0 %v2813_v39  ;;  %1446 = vmatpush1.bf16.msra.mxu1 %v2819_v62 }
 0x577   :  { %1406 = vmatprep.subr.bf16.mxu0 %v2825_v60  ;;  %1447 = vmatprep.subr.bf16.mxu1 %v2831_v34 }
 0x57a   :  { %1407 = vmatpush1.bf16.msra.mxu0 %v2837_v47  ;;  %1448 = vmatpush1.bf16.msra.mxu1 %v2843_v44 }
 0x57b   :  { %1408 = vmatprep.subr.bf16.mxu0 %v2849_v2  ;;  %1449 = vmatprep.subr.bf16.mxu1 %v2855_v3 }
 0x57e   :  { %1409 = vmatpush1.bf16.msra.mxu0 %v2861_v4  ;;  %1450 = vmatpush1.bf16.msra.mxu1 %v2867_v5 }
 0x57f   :  { %1410 = vmatprep.subr.bf16.mxu0 %v2873_v8  ;;  %1451 = vmatprep.subr.bf16.mxu1 %v2879_v48 }
 0x582   :  { %1411 = vmatpush1.bf16.msra.mxu0 %v2885_v49  ;;  %1452 = vmatpush1.bf16.msra.mxu1 %v2891_v50 }
 0x583   :  { %1412 = vmatprep.subr.bf16.mxu0 %v2897_v52  ;;  %1453 = vmatprep.subr.bf16.mxu1 %v2903_v51 }
 0x586   :  { %1413 = vmatpush1.bf16.msra.mxu0 %v2909_v14  ;;  %1454 = vmatpush1.bf16.msra.mxu1 %v2915_v15 }
 0x587   :  { %1594 = vmatprep.subr.bf16.mxu0 %v2723_v12  ;;  %1635 = vmatprep.subr.bf16.mxu1 %v2729_v13 }
 0x63c   :  { %v1237_v17 = vpop.f32.mrb[20].mxu0  ;;  %v1278_v18 = vpop.f32.mrb[20].mxu1 }
 0x63d   :  { %v1289_v25 = vrot.slane %v1237_v17, 3  ;;  %v1293_v26 = vrot.slane %v1237_v17, 4  ;;  %v1239_v27 = vpop.f32.mrb[21].mxu0  ;;  %v1280_v12 = vpop.f32.mrb[21].mxu1  ;;  %v1295_v17 = vrot.slane %v1278_v18, 4 }
 0x63e   :  { %v1290_v28 = vrot.slane %v1239_v27, 3  ;;  %v1294_v13 = vrot.slane %v1239_v27, 4  ;;  %v1241_v24 = vpop.f32.mrb[22].mxu0  ;;  %v1282_v30 = vpop.f32.mrb[22].mxu1  ;;  %v1292_v37 = vrot.slane %v1280_v12, 3  ;;  %v1296_v31 = vrot.slane %v1280_v12, 4 }
 0x63f   :  { %v1305_v29 = vadd.f32 %v1289_v25, %v1186_v38  ;;  %v1309_v32 = vadd.f32 %v1293_v26, %v1190_v16  ;;  %v1242_v35 = vpop.f32.mrb[23].mxu0  ;;  %v1283_v6 = vpop.f32.mrb[23].mxu1  ;;  %v1291_v38 = vrot.slane %v1278_v18, 3  ;;  %v1192_v16 = vunpack.c.l.bf16 %v1185_v45 }
 0x640   :  { %v1306_v55 = vadd.f32 %v1290_v28, %v1187_v19  ;;  %v1310_v54 = vadd.f32 %v1294_v13, %v1191_v20  ;;  %v1308_v25 = vadd.f32 %v1292_v37, %v1189_v59  ;;  %v1312_v26 = vadd.f32 %v1296_v31, %v1193_v21 }
 0x641   :  { %v1863_v22 = vmul.f32 -1.442695, %v1305_v29  ;;  %v1864_v56 = vmul.f32 -1.442695, %v1309_v32  ;;  %v1307_v19 = vadd.f32 %v1291_v38, %v1188_v36  ;;  %v1311_v20 = vadd.f32 %v1295_v17, %v1192_v16 }
 0x642   :  { %v1865_v57 = vmul.f32 -1.442695, %v1306_v55  ;;  %v1866_v58 = vmul.f32 -1.442695, %v1310_v54  ;;  %v1867_v27 = vmul.f32 -1.442695, %v1308_v25 }
 0x643   :  { %2090 = vpow2.f32 %v1863_v22  ;;  %v1868_v28 = vmul.f32 -1.442695, %v1312_v26  ;;  %v1354_v21 = vrot.slane %v2936_v23, 7 }
 0x644   :  { %2092 = vpow2.f32 %v1864_v56 }
 0x645   :  { %2094 = vpow2.f32 %v1865_v57  ;;  %v1353_v57 = vrot.slane %v2934_v33, 7 }
 0x646   :  { %2096 = vpow2.f32 %v1866_v58 }
 0x647   :  { %2098 = vtanh.f32 %v1307_v19 }
 0x648   :  { %2100 = vtanh.f32 %v1311_v20 }
 0x649   :  { %2102 = vpow2.f32 %v1867_v27 }
 0x64a   :  { %2104 = vpow2.f32 %v1868_v28 }
 0x64d   :  { %v2091_v13 = vpop.eup %2090 }
 0x64e   :  { %v2093_v24 = vpop.eup %2092  ;;  %v1319_v30 = vadd.f32 1.0, %v2091_v13 }
 0x64f   :  { %v2095_v12 = vpop.eup %2094  ;;  %v1320_v29 = vadd.f32 1.0, %v2093_v24  ;;  %v1371_v24 = vld [vmem:[%s3131_s4] sm:$0x4] }
 0x650   :  { %v2097_v32 = vpop.eup %2096  ;;  %2106 = vrcp.f32 %v1319_v30  ;;  %v1331_v18 = vadd.f32 1.0, %v2095_v12  ;;  %v1374_v12 = vld [vmem:[%s3131_s4 + $0x4] sm:$0x4] }
 0x651   :  { %2108 = vrcp.f32 %v1320_v29  ;;  %v1332_v40 = vadd.f32 1.0, %v2097_v32  ;;  %v2099_v35 = vpop.eup %2098 }
 0x652   :  { %2110 = vrcp.f32 %v1331_v18  ;;  %v2101_v6 = vpop.eup %2100 }
 0x653   :  { %2112 = vrcp.f32 %v1332_v40  ;;  %v2103_v45 = vpop.eup %2102 }
 0x654   :  { %v2105_v55 = vpop.eup %2104  ;;  %v1345_v58 = vadd.f32 1.0, %v2103_v45 }
 0x655   :  { %v1346_v31 = vadd.f32 1.0, %v2105_v55 }
 0x656   :  { %2114 = vrcp.f32 %v1345_v58 }
 0x657   :  { %2116 = vrcp.f32 %v1346_v31 }
 0x65a   :  { %v2107_v54 = vpop.eup %2106 }
 0x65b   :  { %v2109_v22 = vpop.eup %2108  ;;  %v1359_v56 = vmul.f32 %v2107_v54, %v2099_v35 }
 0x65c   :  { %v2111_v59 = vpop.eup %2110  ;;  %v1360_v37 = vmul.f32 %v2109_v22, %v2101_v6 }
 0x65d   :  { %v2113_v36 = vpop.eup %2112  ;;  %v1357_v38 = vmul.f32 %v2111_v59, %v1353_v57 }
 0x65e   :  { %v1358_v16 = vmul.f32 %v2113_v36, %v1354_v21 }
 0x65f   :  { %v3002_v17 = vadd.f32 %v1359_v56, %v1357_v38 }
 0x660   :  { %v3004_v25 = vadd.f32 %v1360_v37, %v1358_v16  ;;  %v2115_v33 = vpop.eup %2114 }
 0x661   :  { %2118 = vtanh.f32 %v3002_v17  ;;  %v2117_v26 = vpop.eup %2116 }
 0x662   :  { %2120 = vtanh.f32 %v3004_v25 }
 0x66b   :  { %v2119_v19 = vpop.eup %2118 }
 0x66c   :  { %v2121_v20 = vpop.eup %2120  ;;  %v1365_v23 = vmul.f32 %v2119_v19, %v2115_v33 }
 0x66d   :  { %v1366_v27 = vmul.f32 %v2121_v20, %v2117_v26 }
 0x66e   :  { %v1367_v28 = vpack.c.bf16 %v1365_v23, %v1365_v23 }
 0x66f   :  { %v1368_v13 = vpack.c.bf16 %v1366_v27, %v1366_v27 }
 0x670   :  { %v1372_v30 = vsel %vm1370_vm14, %v1367_v28, %v1371_v24  ;;  %v1391_v29 = vunpack.c.l.b16 %v1367_v28 }
 0x671   :  { %1373 = vst [vmem:[%s3131_s4] sm:$0x4] %v1372_v30  ;;  %v1375_v32 = vsel %vm1370_vm14, %v1368_v13, %v1374_v12  ;;  %v1392_v18 = vunpack.c.l.b16 %v1368_v13 }
 0x672   :  { %1376 = vst [vmem:[%s3131_s4 + $0x4] sm:$0x4] %v1375_v32  ;;  %v1393_v40 = vrot.slane %v1391_v29, 5 }
 0x673   :  { %v1394_v35 = vrot.slane %v1392_v18, 4  ;;  %v1548_v18 = vrot.slane %v3002_v17, 7 }
 0x675   :  { %v1395_v6 = vsel %vm422_vm3, %v1394_v35, %v1393_v40 }
 0x676   :  { %v1396_v45 = vpack.c.b16 %v1395_v6, %v1395_v6 }
 0x678   :  { %1431 = vmatmul.mubr.bf16.vlgmr.msra.gmra.mrb[24].mxu0 %v1396_v45  ;;  %1472 = vmatmul.mubr.bf16.vlgmr.msra.gmra.mrb[24].mxu1 %v1396_v45  ;;  %v1549_v45 = vrot.slane %v3004_v25, 7 }
 0x679   :  { %1595 = vmatpush1.bf16.msra.mxu0 %v2661_v0  ;;  %1636 = vmatpush1.bf16.msra.mxu1 %v2770_v63  ;;  %v1379_v0 = vld [vmem:[%s3130_s0 + $0x10] sm:$0x88] }
 0x67a   :  { %1596 = vmatprep.subr.bf16.mxu0 %v2668_v9  ;;  %1637 = vmatprep.subr.bf16.mxu1 %v2777_v41  ;;  %v1386_v63 = vunpack.c.h.bf16 %v1379_v0 }
 0x67b   :  { %1626 = vmatprep.mubr.bf16.mxu0 %v2218_v1  ;;  %1667 = vmatprep.mubr.bf16.mxu1 %v2218_v1  ;;  %v1377_v1 = vld [vmem:[%s3130_s0] sm:$0x88] }
 0x67c   :  { %v1381_v9 = vunpack.c.l.bf16 %v1377_v1 }
 0x67d   :  { %1597 = vmatpush1.bf16.msra.mxu0 %v2677_v53  ;;  %1638 = vmatpush1.bf16.msra.mxu1 %v2786_v43  ;;  %v1385_v53 = vunpack.c.l.bf16 %v1379_v0 }
 0x67e   :  { %1598 = vmatprep.subr.bf16.mxu0 %v2684_v7  ;;  %1639 = vmatprep.subr.bf16.mxu1 %v2793_v42 }
 0x681   :  { %1599 = vmatpush1.bf16.msra.mxu0 %v2691_v10  ;;  %1640 = vmatpush1.bf16.msra.mxu1 %v2800_v61 }
 0x682   :  { %1600 = vmatprep.subr.bf16.mxu0 %v2698_v11  ;;  %1641 = vmatprep.subr.bf16.mxu1 %v2807_v46  ;;  %v1382_v11 = vunpack.c.h.bf16 %v1377_v1 }
 0x685   :  { %1601 = vmatpush1.bf16.msra.mxu0 %v2813_v39  ;;  %1642 = vmatpush1.bf16.msra.mxu1 %v2819_v62 }
 0x686   :  { %1602 = vmatprep.subr.bf16.mxu0 %v2825_v60  ;;  %1643 = vmatprep.subr.bf16.mxu1 %v2831_v34 }
 0x689   :  { %1603 = vmatpush1.bf16.msra.mxu0 %v2837_v47  ;;  %1644 = vmatpush1.bf16.msra.mxu1 %v2843_v44  ;;  %v1378_v44 = vld [vmem:[%s3130_s0 + $0x8] sm:$0x88] }
 0x68a   :  { %1604 = vmatprep.subr.bf16.mxu0 %v2849_v2  ;;  %1645 = vmatprep.subr.bf16.mxu1 %v2855_v3  ;;  %v1383_v54 = vunpack.c.l.bf16 %v1378_v44 }
 0x68d   :  { %1605 = vmatpush1.bf16.msra.mxu0 %v2861_v4  ;;  %1646 = vmatpush1.bf16.msra.mxu1 %v2867_v5  ;;  %v1380_v4 = vld [vmem:[%s3130_s0 + $0x18] sm:$0x88] }
 0x68e   :  { %1606 = vmatprep.subr.bf16.mxu0 %v2873_v8  ;;  %1647 = vmatprep.subr.bf16.mxu1 %v2879_v48  ;;  %v1387_v56 = vunpack.c.l.bf16 %v1380_v4 }
 0x691   :  { %1607 = vmatpush1.bf16.msra.mxu0 %v2885_v49  ;;  %1648 = vmatpush1.bf16.msra.mxu1 %v2891_v50 }
 0x692   :  { %1608 = vmatprep.subr.bf16.mxu0 %v2897_v52  ;;  %1649 = vmatprep.subr.bf16.mxu1 %v2903_v51  ;;  %v1384_v51 = vunpack.c.h.bf16 %v1378_v44 }
 0x695   :  { %1609 = vmatpush1.bf16.msra.mxu0 %v2909_v14  ;;  %1650 = vmatpush1.bf16.msra.mxu1 %v2915_v15  ;;  %v1388_v15 = vunpack.c.h.bf16 %v1380_v4 }
 0x74b   :  { %v1432_v7 = vpop.f32.mrb[24].mxu0  ;;  %v1473_v10 = vpop.f32.mrb[24].mxu1 }
 0x74c   :  { %v1484_v41 = vrot.slane %v1432_v7, 2  ;;  %v1488_v43 = vrot.slane %v1432_v7, 3  ;;  %v1434_v42 = vpop.f32.mrb[25].mxu0  ;;  %v1475_v61 = vpop.f32.mrb[25].mxu1  ;;  %v1486_v22 = vrot.slane %v1473_v10, 2  ;;  %v1490_v57 = vrot.slane %v1473_v10, 3 }
 0x74d   :  { %v1485_v46 = vrot.slane %v1434_v42, 2  ;;  %v1489_v39 = vrot.slane %v1434_v42, 3  ;;  %v1436_v62 = vpop.f32.mrb[26].mxu0  ;;  %v1477_v60 = vpop.f32.mrb[26].mxu1  ;;  %v1487_v14 = vrot.slane %v1475_v61, 2  ;;  %v1491_v55 = vrot.slane %v1475_v61, 3 }
 0x74e   :  { %v1500_v34 = vadd.f32 %v1484_v41, %v1381_v9  ;;  %v1504_v47 = vadd.f32 %v1488_v43, %v1385_v53  ;;  %v1437_v2 = vpop.f32.mrb[27].mxu0  ;;  %v1478_v3 = vpop.f32.mrb[27].mxu1  ;;  %v1502_v37 = vadd.f32 %v1486_v22, %v1383_v54  ;;  %v1506_v21 = vadd.f32 %v1490_v57, %v1387_v56  ;;  %v1567_v42 = vld [vmem:[%s3131_s4] sm:$0x8] }
 0x74f   :  { %v1501_v5 = vadd.f32 %v1485_v46, %v1382_v11  ;;  %v1505_v8 = vadd.f32 %v1489_v39, %v1386_v63  ;;  %v1503_v58 = vadd.f32 %v1487_v14, %v1384_v51  ;;  %v1507_v59 = vadd.f32 %v1491_v55, %v1388_v15  ;;  %v1570_v46 = vld [vmem:[%s3131_s4 + $0x4] sm:$0x8] }
 0x750   :  { %v1869_v48 = vmul.f32 -1.442695, %v1500_v34  ;;  %v1870_v49 = vmul.f32 -1.442695, %v1504_v47 }
 0x751   :  { %v1871_v50 = vmul.f32 -1.442695, %v1501_v5  ;;  %v1872_v52 = vmul.f32 -1.442695, %v1505_v8  ;;  %v1873_v31 = vmul.f32 -1.442695, %v1503_v58 }
 0x752   :  { %2122 = vpow2.f32 %v1869_v48  ;;  %v1874_v36 = vmul.f32 -1.442695, %v1507_v59  ;;  %v1573_v5 = vld [vmem:[%s3130_s0] sm:$0x88]  ;;  %v1575_v8 = vld [vmem:[%s3130_s0 + $0x10] sm:$0x88] }
 0x753   :  { %2124 = vpow2.f32 %v1870_v49  ;;  %v1577_v48 = vunpack.c.l.bf16 %v1573_v5  ;;  %v1581_v49 = vunpack.c.l.bf16 %v1575_v8  ;;  %v1578_v51 = vunpack.c.h.bf16 %v1573_v5 }
 0x754   :  { %2126 = vpow2.f32 %v1871_v50  ;;  %v1582_v14 = vunpack.c.h.bf16 %v1575_v8 }
 0x755   :  { %2128 = vpow2.f32 %v1872_v52 }
 0x756   :  { %2130 = vtanh.f32 %v1502_v37 }
 0x757   :  { %2132 = vtanh.f32 %v1506_v21 }
 0x758   :  { %2134 = vpow2.f32 %v1873_v31  ;;  %v1574_v31 = vld [vmem:[%s3130_s0 + $0x8] sm:$0x88] }
 0x759   :  { %2136 = vpow2.f32 %v1874_v36 }
 0x75c   :  { %v2123_v38 = vpop.eup %2122 }
 0x75d   :  { %v2125_v16 = vpop.eup %2124  ;;  %v1514_v33 = vadd.f32 1.0, %v2123_v38 }
 0x75e   :  { %v2127_v26 = vpop.eup %2126  ;;  %v1515_v19 = vadd.f32 1.0, %v2125_v16  ;;  %v1576_v16 = vld [vmem:[%s3130_s0 + $0x18] sm:$0x88] }
 0x75f   :  { %v2129_v20 = vpop.eup %2128  ;;  %2138 = vrcp.f32 %v1514_v33  ;;  %v1526_v23 = vadd.f32 1.0, %v2127_v26 }
 0x760   :  { %2140 = vrcp.f32 %v1515_v19  ;;  %v1527_v27 = vadd.f32 1.0, %v2129_v20  ;;  %v2131_v28 = vpop.eup %2130 }
 0x761   :  { %2142 = vrcp.f32 %v1526_v23  ;;  %v2133_v13 = vpop.eup %2132 }
 0x762   :  { %2144 = vrcp.f32 %v1527_v27  ;;  %v2135_v24 = vpop.eup %2134 }
 0x763   :  { %v2137_v30 = vpop.eup %2136  ;;  %v1540_v40 = vadd.f32 1.0, %v2135_v24  ;;  %v1584_v24 = vunpack.c.h.bf16 %v1576_v16 }
 0x764   :  { %v1541_v1 = vadd.f32 1.0, %v2137_v30 }
 0x765   :  { %2146 = vrcp.f32 %v1540_v40 }
 0x766   :  { %2148 = vrcp.f32 %v1541_v1 }
 0x769   :  { %v2139_v12 = vpop.eup %2138 }
 0x76a   :  { %v2141_v29 = vpop.eup %2140  ;;  %v1554_v32 = vmul.f32 %v2139_v12, %v2131_v28  ;;  %v1580_v28 = vunpack.c.h.bf16 %v1574_v31  ;;  %v1579_v12 = vunpack.c.l.bf16 %v1574_v31 }
 0x76b   :  { %v2143_v35 = vpop.eup %2142  ;;  %v1555_v6 = vmul.f32 %v2141_v29, %v2133_v13 }
 0x76c   :  { %v2145_v0 = vpop.eup %2144  ;;  %v1552_v9 = vmul.f32 %v2143_v35, %v1548_v18 }
 0x76d   :  { %v1553_v53 = vmul.f32 %v2145_v0, %v1549_v45 }
 0x76e   :  { %v3068_v7 = vadd.f32 %v1554_v32, %v1552_v9  ;;  %v1583_v32 = vunpack.c.l.bf16 %v1576_v16 }
 0x76f   :  { %v3070_v10 = vadd.f32 %v1555_v6, %v1553_v53  ;;  %v2147_v17 = vpop.eup %2146 }
 0x770   :  { %2150 = vtanh.f32 %v3068_v7  ;;  %v2149_v11 = vpop.eup %2148 }
 0x771   :  { %2152 = vtanh.f32 %v3070_v10 }
 0x77a   :  { %v2151_v63 = vpop.eup %2150 }
 0x77b   :  { %v2153_v25 = vpop.eup %2152  ;;  %v1560_v41 = vmul.f32 %v2151_v63, %v2147_v17 }
 0x77c   :  { %v1561_v43 = vmul.f32 %v2153_v25, %v2149_v11 }
 0x77d   :  { %v1562_v61 = vpack.c.bf16 %v1560_v41, %v1560_v41 }
 0x77e   :  { %v1563_v39 = vpack.c.bf16 %v1561_v43, %v1561_v43 }
 0x77f   :  { %v1568_v62 = vsel %vm1566_vm1, %v1562_v61, %v1567_v42  ;;  %v1587_v60 = vunpack.c.l.b16 %v1562_v61 }
 0x780   :  { %1569 = vst [vmem:[%s3131_s4] sm:$0x8] %v1568_v62  ;;  %v1571_v34 = vsel %vm1566_vm1, %v1563_v39, %v1570_v46  ;;  %v1588_v47 = vunpack.c.l.b16 %v1563_v39 }
 0x781   :  { %1572 = vst [vmem:[%s3131_s4 + $0x4] sm:$0x8] %v1571_v34  ;;  %v1589_v44 = vrot.slane %v1587_v60, 6 }
 0x782   :  { %v1590_v2 = vrot.slane %v1588_v47, 5  ;;  %v1744_v47 = vrot.slane %v3068_v7, 7 }
 0x784   :  { %v1591_v3 = vsel %vm422_vm3, %v1590_v2, %v1589_v44  ;;  %vm1761_vm3 = vmand %vm1564_vm15, %vm1760_vm2 }
 0x785   :  { %v1592_v4 = vpack.c.b16 %v1591_v3, %v1591_v3 }
 0x787   :  { %1627 = vmatmul.mubr.bf16.vlgmr.msra.gmra.mrb[28].mxu0 %v1592_v4  ;;  %1668 = vmatmul.mubr.bf16.vlgmr.msra.gmra.mrb[28].mxu1 %v1592_v4  ;;  %v1745_v4 = vrot.slane %v3070_v10, 7 }
 0x85a   :  { %v1628_v50 = vpop.f32.mrb[28].mxu0  ;;  %v1669_v52 = vpop.f32.mrb[28].mxu1 }
 0x85b   :  { %v1680_v15 = vrot.slane %v1628_v50, 1  ;;  %v1684_v55 = vrot.slane %v1628_v50, 2  ;;  %v1630_v54 = vpop.f32.mrb[29].mxu0  ;;  %v1671_v22 = vpop.f32.mrb[29].mxu1  ;;  %v1682_v29 = vrot.slane %v1669_v52, 1  ;;  %v1686_v18 = vrot.slane %v1669_v52, 2 }
 0x85c   :  { %v1681_v56 = vrot.slane %v1630_v54, 1  ;;  %v1685_v57 = vrot.slane %v1630_v54, 2  ;;  %v1632_v58 = vpop.f32.mrb[30].mxu0  ;;  %v1673_v59 = vpop.f32.mrb[30].mxu1  ;;  %v1683_v13 = vrot.slane %v1671_v22, 1  ;;  %v1687_v30 = vrot.slane %v1671_v22, 2 }
 0x85d   :  { %v1696_v37 = vadd.f32 %v1680_v15, %v1577_v48  ;;  %v1700_v21 = vadd.f32 %v1684_v55, %v1581_v49  ;;  %v1633_v36 = vpop.f32.mrb[31].mxu0  ;;  %v1674_v38 = vpop.f32.mrb[31].mxu1  ;;  %v1698_v6 = vadd.f32 %v1682_v29, %v1579_v12  ;;  %v1702_v45 = vadd.f32 %v1686_v18, %v1583_v32 }
 0x85e   :  { %v1697_v33 = vadd.f32 %v1681_v56, %v1578_v51  ;;  %v1701_v26 = vadd.f32 %v1685_v57, %v1582_v14  ;;  %v1699_v40 = vadd.f32 %v1683_v13, %v1580_v28  ;;  %v1703_v35 = vadd.f32 %v1687_v30, %v1584_v24  ;;  %v1762_v57 = vld [vmem:[%s3131_s4] sm:$0x8] }
 0x85f   :  { %v1875_v19 = vmul.f32 -1.442695, %v1696_v37  ;;  %v1876_v20 = vmul.f32 -1.442695, %v1700_v21  ;;  %v1765_v37 = vld [vmem:[%s3131_s4 + $0x4] sm:$0x8] }
 0x860   :  { %v1877_v23 = vmul.f32 -1.442695, %v1697_v33  ;;  %v1878_v27 = vmul.f32 -1.442695, %v1701_v26  ;;  %v1879_v1 = vmul.f32 -1.442695, %v1699_v40 }
 0x861   :  { %2154 = vpow2.f32 %v1875_v19  ;;  %v1880_v0 = vmul.f32 -1.442695, %v1703_v35 }
 0x862   :  { %2156 = vpow2.f32 %v1876_v20 }
 0x863   :  { %2158 = vpow2.f32 %v1877_v23 }
 0x864   :  { %2160 = vpow2.f32 %v1878_v27 }
 0x865   :  { %2162 = vtanh.f32 %v1698_v6 }
 0x866   :  { %2164 = vtanh.f32 %v1702_v45 }
 0x867   :  { %2166 = vpow2.f32 %v1879_v1 }
 0x868   :  { %2168 = vpow2.f32 %v1880_v0 }
 0x86b   :  { %v2155_v9 = vpop.eup %2154 }
 0x86c   :  { %v2157_v53 = vpop.eup %2156  ;;  %v1710_v17 = vadd.f32 1.0, %v2155_v9 }
 0x86d   :  { %v2159_v11 = vpop.eup %2158  ;;  %v1711_v63 = vadd.f32 1.0, %v2157_v53 }
 0x86e   :  { %v2161_v25 = vpop.eup %2160  ;;  %2170 = vrcp.f32 %v1710_v17  ;;  %v1722_v41 = vadd.f32 1.0, %v2159_v11 }
 0x86f   :  { %2172 = vrcp.f32 %v1711_v63  ;;  %v1723_v43 = vadd.f32 1.0, %v2161_v25  ;;  %v2163_v42 = vpop.eup %2162 }
 0x870   :  { %2174 = vrcp.f32 %v1722_v41  ;;  %v2165_v61 = vpop.eup %2164 }
 0x871   :  { %2176 = vrcp.f32 %v1723_v43  ;;  %v2167_v46 = vpop.eup %2166 }
 0x872   :  { %v2169_v39 = vpop.eup %2168  ;;  %v1736_v44 = vadd.f32 1.0, %v2167_v46 }
 0x873   :  { %v1737_v5 = vadd.f32 1.0, %v2169_v39 }
 0x874   :  { %2178 = vrcp.f32 %v1736_v44 }
 0x875   :  { %2180 = vrcp.f32 %v1737_v5 }
 0x878   :  { %v2171_v62 = vpop.eup %2170 }
 0x879   :  { %v2173_v60 = vpop.eup %2172  ;;  %v1750_v34 = vmul.f32 %v2171_v62, %v2163_v42 }
 0x87a   :  { %v2175_v2 = vpop.eup %2174  ;;  %v1751_v3 = vmul.f32 %v2173_v60, %v2165_v61 }
 0x87b   :  { %v2177_v8 = vpop.eup %2176  ;;  %v1748_v48 = vmul.f32 %v2175_v2, %v1744_v47 }
 0x87c   :  { %v1749_v49 = vmul.f32 %v2177_v8, %v1745_v4 }
 0x87d   :  { %v1752_v50 = vadd.f32 %v1750_v34, %v1748_v48 }
 0x87e   :  { %v1753_v52 = vadd.f32 %v1751_v3, %v1749_v49  ;;  %v2179_v10 = vpop.eup %2178 }
 0x87f   :  { %2182 = vtanh.f32 %v1752_v50  ;;  %1780 = vst [vmem:[#allocation3 - $0x7] sm:$0x80] %v1752_v50  ;;  %1787 = vst [vmem:[%s3132_s6 - $0x7] sm:$0x80] %v1752_v50  ;;  %v2181_v51 = vpop.eup %2180 }
 0x880   :  { %2184 = vtanh.f32 %v1753_v52  ;;  %v1777_v7 = vrot.slane %v1753_v52, 7 }
 0x882   :  { %1781 = vst [vmem:[#allocation3 + $0x1] sm:$0x1] %v1777_v7  ;;  %1788 = vst [vmem:[%s3132_s6 + $0x1] sm:$0x1] %v1777_v7 }
 0x889   :  { %v2183_v14 = vpop.eup %2182 }
 0x88a   :  { %v2185_v15 = vpop.eup %2184  ;;  %v1756_v55 = vmul.f32 %v2183_v14, %v2179_v10 }
 0x88b   :  { %v1757_v54 = vmul.f32 %v2185_v15, %v2181_v51 }
 0x88c   :  { %v1758_v22 = vpack.c.bf16 %v1756_v55, %v1756_v55  ;;  %1773 = vst [vmem:[#allocation2 - $0x7] sm:$0x80] %v1756_v55  ;;  %1785 = vst [vmem:[%s3133_s5 - $0x7] sm:$0x80] %v1756_v55 }
 0x88d   :  { %v1759_v56 = vpack.c.bf16 %v1757_v54, %v1757_v54  ;;  %v1770_v58 = vrot.slane %v1757_v54, 7 }
 0x88e   :  { %v1763_v59 = vsel %vm1761_vm3, %v1758_v22, %v1762_v57 }
 0x88f   :  { %1764 = vst [vmem:[%s3131_s4] sm:$0x8] %v1763_v59  ;;  %v1766_v21 = vsel %vm1761_vm3, %v1759_v56, %v1765_v37  ;;  %1774 = vst [vmem:[#allocation2 + $0x1] sm:$0x1] %v1770_v58 }
 0x890   :  { %1786 = vst [vmem:[%s3133_s5 + $0x1] sm:$0x1] %v1770_v58  ;;  %1767 = vst [vmem:[%s3131_s4 + $0x4] sm:$0x8] %v1766_v21 }

</bundles_post_ra>
